<compile_context>
chip_gen: v7x
topology: tpu7x:2x2x1
jax: 0.10.0
libtpu: 0.0.40
codegen_flags: <defaults>
</compile_context>

<pallas_src>
import jax
import jax.numpy as jnp
import numpy as np
from jax.experimental import pallas as pl
from jax.experimental.pallas import tpu as pltpu


def _lstm_linear_kernel(x_ref, wih0_ref, whh0_ref, b0_ref,
                        w1_ref, b1_ref, wlin_ref, out_ref):
    """Whole model in one kernel: 2-layer LSTM over time + fused Linear head.

    x_ref:    (T*Bp, F)   time-major, rows t*Bp:(t+1)*Bp belong to time step t
    wih0_ref: (F, 4H)     fused gate weights, gate order i, f, o, g
    whh0_ref: (H, 4H)
    b0_ref:   (1, 4H)     combined b_ih + b_hh (layer 0)
    w1_ref:   (2H, 4H)    stacked [wih1; whh1], gate order i, f, o, g
    b1_ref:   (Bp, 4H)    combined b_ih + b_hh (layer 1), pre-broadcast
    wlin_ref: (T, Bp, H)  Linear(1) weight per time step, pre-broadcast
    out_ref:  (Bp, 1)
    """
    H = whh0_ref.shape[0]
    T = wlin_ref.shape[0]
    Bp = wlin_ref.shape[1]

    # Hoisted loads: weights / biases read once, reused across the loop.
    whh0 = whh0_ref[...]
    w1 = w1_ref[...]
    b1 = b1_ref[...]

    # Layer-0 input projections for every time step in one lane-dense matmul
    # (bias folded in), off the serial critical path.  Kept as a value
    # (T*Bp x 4H = 2 vregs at these shapes) -- no VMEM round trip.
    xp = (jnp.dot(x_ref[...], wih0_ref[...],
                  preferred_element_type=jnp.float32) + b0_ref[...])

    def lstm_gates(s, c):
        # s: (Bp, 4H) fused pre-activations, gate order i, f, o, g.
        sig = jax.nn.sigmoid(s[:, 0:3 * H])      # one EUP slab: i, f, o
        g = jnp.tanh(s[:, 3 * H:4 * H])          # one EUP slab: g
        i = sig[:, 0:H]
        f = sig[:, H:2 * H]
        o = sig[:, 2 * H:3 * H]
        c_new = f * c + i * g
        h_new = o * jnp.tanh(c_new)
        return h_new, c_new

    z = jnp.zeros((Bp, H), jnp.float32)
    h0, c0, h1, c1, acc = z, z, z, z, z

    # Fully unrolled (T is small); all xp slices are static and 8-sublane
    # aligned because Bp is a multiple of 8.
    for t in range(T):
        xp_t = xp[t * Bp:(t + 1) * Bp, :]                        # (Bp, 4H)
        # Layer 0: only the recurrent matmul is on the serial chain.
        s0 = xp_t + jnp.dot(h0, whh0, preferred_element_type=jnp.float32)
        h0, c0 = lstm_gates(s0, c0)
        # Layer 1: single fused matmul over stacked [wih1; whh1].
        h01 = jnp.concatenate([h0, h1], axis=-1)                 # (Bp, 2H)
        s1 = jnp.dot(h01, w1, preferred_element_type=jnp.float32) + b1
        h1, c1 = lstm_gates(s1, c1)
        # Flatten + Linear folded in: elementwise accumulate, reduce at end.
        acc = acc + h1 * wlin_ref[t]                             # (Bp, H)

    # Single cross-lane reduction + narrow store in the epilogue.
    out_ref[...] = jnp.sum(acc, axis=-1, keepdims=True)


def audio_model_reg_forward(x, params):
    """x: (B, T, F) float32 -> (B, 1) float32 (matches the torch module)."""
    B, T, F = x.shape
    H = params["whh_l0"].shape[1]
    Bp = ((B + 7) // 8) * 8   # pad batch to an 8-sublane multiple

    def perm_gate_cols(w):
        # torch layout (4H, in) -> (in, 4H) with gate order i, f, o, g.
        wt = w.T.astype(jnp.float32)
        return jnp.concatenate(
            [wt[:, 0:2 * H], wt[:, 3 * H:4 * H], wt[:, 2 * H:3 * H]], axis=1)

    def perm_gate_bias(b):
        b = b.astype(jnp.float32)
        return jnp.concatenate([b[0:2 * H], b[3 * H:4 * H], b[2 * H:3 * H]])

    wih0 = perm_gate_cols(params["wih_l0"])                      # (F, 4H)
    whh0 = perm_gate_cols(params["whh_l0"])                      # (H, 4H)
    b0 = perm_gate_bias(params["bih_l0"] + params["bhh_l0"]).reshape(1, 4 * H)
    wih1 = perm_gate_cols(params["wih_l1"])                      # (H, 4H)
    whh1 = perm_gate_cols(params["whh_l1"])                      # (H, 4H)
    w1 = jnp.concatenate([wih1, whh1], axis=0)                   # (2H, 4H)
    b1 = perm_gate_bias(params["bih_l1"] + params["bhh_l1"]).reshape(1, 4 * H)
    b1 = jnp.broadcast_to(b1, (Bp, 4 * H))                       # pre-broadcast

    # Linear(1) weight per time step, pre-broadcast to the padded batch.
    wlin = params["lin_w"].reshape(T, H).astype(jnp.float32)
    wlin = jnp.broadcast_to(wlin[:, None, :], (T, Bp, H))        # (T, Bp, H)

    # Time-major, batch padded to Bp, flattened to (T*Bp, F).
    x_tm = jnp.transpose(x, (1, 0, 2)).astype(jnp.float32)       # (T, B, F)
    x_p = jnp.zeros((T, Bp, F), jnp.float32).at[:, :B, :].set(x_tm)
    x_2d = x_p.reshape(T * Bp, F)

    out = pl.pallas_call(
        _lstm_linear_kernel,
        out_shape=jax.ShapeDtypeStruct((Bp, 1), jnp.float32),
        in_specs=[pl.BlockSpec(memory_space=pltpu.MemorySpace.VMEM)] * 7,
        out_specs=pl.BlockSpec(memory_space=pltpu.MemorySpace.VMEM),
    )(x_2d, wih0, whh0, b0, w1, b1, wlin)

    # Drop batch padding; scalar output bias added outside the kernel.
    return out[:B] + params["lin_b"].reshape(1, 1).astype(jnp.float32)


def init_params(key, num_features, num_hidden, length):
    """Deterministic init mirroring torch.nn.LSTM / Linear shapes."""
    keys = jax.random.split(key, 10)
    kh = 1.0 / np.sqrt(num_hidden)
    kl = 1.0 / np.sqrt(num_hidden * length)
    u = lambda kk, shape, b: jax.random.uniform(kk, shape, jnp.float32, -b, b)
    return {
        "wih_l0": u(keys[0], (4 * num_hidden, num_features), kh),
        "whh_l0": u(keys[1], (4 * num_hidden, num_hidden), kh),
        "bih_l0": u(keys[2], (4 * num_hidden,), kh),
        "bhh_l0": u(keys[3], (4 * num_hidden,), kh),
        "wih_l1": u(keys[4], (4 * num_hidden, num_hidden), kh),
        "whh_l1": u(keys[5], (4 * num_hidden, num_hidden), kh),
        "bih_l1": u(keys[6], (4 * num_hidden,), kh),
        "bhh_l1": u(keys[7], (4 * num_hidden,), kh),
        "lin_w": u(keys[8], (1, num_hidden * length), kl),
        "lin_b": u(keys[9], (1,), kl),
    }


def reference_forward(x, params):
    """Pure-JAX reference of the torch forward pass (for verification)."""
    B, T, _ = x.shape
    H = params["whh_l0"].shape[1]

    def layer(xseq, wih, whh, bih, bhh):
        h = jnp.zeros((B, H), jnp.float32)
        c = jnp.zeros((B, H), jnp.float32)
        outs = []
        for t in range(T):
            g = xseq[:, t] @ wih.T + h @ whh.T + bih + bhh
            i = jax.nn.sigmoid(g[:, :H])
            f = jax.nn.sigmoid(g[:, H:2 * H])
            gg = jnp.tanh(g[:, 2 * H:3 * H])
            o = jax.nn.sigmoid(g[:, 3 * H:])
            c = f * c + i * gg
            h = o * jnp.tanh(c)
            outs.append(h)
        return jnp.stack(outs, axis=1)

    y1 = layer(x, params["wih_l0"], params["whh_l0"], params["bih_l0"], params["bhh_l0"])
    y2 = layer(y1, params["wih_l1"], params["whh_l1"], params["bih_l1"], params["bhh_l1"])
    flat = y2.reshape(B, -1)
    return flat @ params["lin_w"].T + params["lin_b"]


if __name__ == "__main__":
    # Small shapes consistent with the module signature:
    # batch=2, num_features=13, num_hidden=32, length(seq)=8.
    B, F, H, T = 2, 13, 32, 8
    key = jax.random.PRNGKey(0)
    kx, kp = jax.random.split(key)
    x = jax.random.normal(kx, (B, T, F), jnp.float32)
    params = init_params(kp, F, H, T)

    y = audio_model_reg_forward(x, params)
    jax.block_until_ready(y)

    y_ref = reference_forward(x, params)
    assert y.shape == (B, 1)
    assert np.allclose(np.asarray(y), np.asarray(y_ref), atol=1e-4, rtol=1e-4)
    print("KERNEL_OK")
</pallas_src>

<mosaic_0001>
module attributes {stable_mosaic.version = 11 : i64} {
  func.func @_lstm_linear_kernel(%arg0: memref<64x13xf32, #tpu.memory_space<vmem>>, %arg1: memref<13x128xf32, #tpu.memory_space<vmem>>, %arg2: memref<32x128xf32, #tpu.memory_space<vmem>>, %arg3: memref<1x128xf32, #tpu.memory_space<vmem>>, %arg4: memref<64x128xf32, #tpu.memory_space<vmem>>, %arg5: memref<8x128xf32, #tpu.memory_space<vmem>>, %arg6: memref<8x8x32xf32, #tpu.memory_space<vmem>>, %arg7: memref<8x1xf32, #tpu.memory_space<vmem>>) attributes {dimension_semantics = [], scalar_prefetch = 0 : i64, scratch_operands = 0 : i64, tpu.core_type = #tpu.core_type<tc>} {
    %c0 = arith.constant 0 : index
    %c0_0 = arith.constant 0 : index
    %0 = vector.load %arg2[%c0, %c0_0] : memref<32x128xf32, #tpu.memory_space<vmem>>, vector<32x128xf32>
    %c0_1 = arith.constant 0 : index
    %c0_2 = arith.constant 0 : index
    %1 = vector.load %arg4[%c0_1, %c0_2] : memref<64x128xf32, #tpu.memory_space<vmem>>, vector<64x128xf32>
    %c0_3 = arith.constant 0 : index
    %c0_4 = arith.constant 0 : index
    %2 = vector.load %arg5[%c0_3, %c0_4] : memref<8x128xf32, #tpu.memory_space<vmem>>, vector<8x128xf32>
    %c0_5 = arith.constant 0 : index
    %c0_6 = arith.constant 0 : index
    %3 = vector.load %arg0[%c0_5, %c0_6] : memref<64x13xf32, #tpu.memory_space<vmem>>, vector<64x13xf32>
    %c0_7 = arith.constant 0 : index
    %c0_8 = arith.constant 0 : index
    %4 = vector.load %arg1[%c0_7, %c0_8] : memref<13x128xf32, #tpu.memory_space<vmem>>, vector<13x128xf32>
    %cst = arith.constant dense<0.000000e+00> : vector<64x128xf32>
    %5 = tpu.matmul %3, %4, %cst {dimension_numbers = #tpu.dot_dimension_numbers<[1], [0], [0], [1], [0, 0, 1, 1], [], []>} : vector<64x13xf32>, vector<13x128xf32>, vector<64x128xf32> -> vector<64x128xf32>
    %c0_9 = arith.constant 0 : index
    %c0_10 = arith.constant 0 : index
    %6 = vector.load %arg3[%c0_9, %c0_10] : memref<1x128xf32, #tpu.memory_space<vmem>>, vector<1x128xf32>
    %7 = vector.broadcast %6 : vector<1x128xf32> to vector<64x128xf32>
    %8 = arith.addf %5, %7 : vector<64x128xf32>
    %cst_11 = arith.constant 0.000000e+00 : f32
    %9 = vector.broadcast %cst_11 : f32 to vector<8x32xf32>
    %10 = vector.extract_strided_slice %8 {offsets = [0, 0], sizes = [8, 128], strides = [1, 1]} : vector<64x128xf32> to vector<8x128xf32>
    %cst_12 = arith.constant dense<0.000000e+00> : vector<8x128xf32>
    %11 = tpu.matmul %9, %0, %cst_12 {dimension_numbers = #tpu.dot_dimension_numbers<[1], [0], [0], [1], [0, 0, 1, 1], [], []>} : vector<8x32xf32>, vector<32x128xf32>, vector<8x128xf32> -> vector<8x128xf32>
    %12 = arith.addf %10, %11 : vector<8x128xf32>
    %13 = vector.extract_strided_slice %12 {offsets = [0, 0], sizes = [8, 96], strides = [1, 1]} : vector<8x128xf32> to vector<8x96xf32>
    %14 = arith.negf %13 : vector<8x96xf32>
    %15 = math.exp %14 : vector<8x96xf32>
    %cst_13 = arith.constant 1.000000e+00 : f32
    %16 = vector.broadcast %cst_13 : f32 to vector<8x96xf32>
    %17 = arith.addf %16, %15 : vector<8x96xf32>
    %18 = arith.divf %16, %17 : vector<8x96xf32>
    %19 = vector.extract_strided_slice %12 {offsets = [0, 96], sizes = [8, 32], strides = [1, 1]} : vector<8x128xf32> to vector<8x32xf32>
    %20 = math.tanh %19 : vector<8x32xf32>
    %21 = vector.extract_strided_slice %18 {offsets = [0, 0], sizes = [8, 32], strides = [1, 1]} : vector<8x96xf32> to vector<8x32xf32>
    %22 = vector.extract_strided_slice %18 {offsets = [0, 32], sizes = [8, 32], strides = [1, 1]} : vector<8x96xf32> to vector<8x32xf32>
    %23 = vector.extract_strided_slice %18 {offsets = [0, 64], sizes = [8, 32], strides = [1, 1]} : vector<8x96xf32> to vector<8x32xf32>
    %24 = arith.mulf %22, %9 : vector<8x32xf32>
    %25 = arith.mulf %21, %20 : vector<8x32xf32>
    %26 = arith.addf %24, %25 : vector<8x32xf32>
    %27 = math.tanh %26 : vector<8x32xf32>
    %28 = arith.mulf %23, %27 : vector<8x32xf32>
    %29 = tpu.concatenate %28, %9 in 1 : vector<8x32xf32>, vector<8x32xf32> -> vector<8x64xf32>
    %cst_14 = arith.constant dense<0.000000e+00> : vector<8x128xf32>
    %30 = tpu.matmul %29, %1, %cst_14 {dimension_numbers = #tpu.dot_dimension_numbers<[1], [0], [0], [1], [0, 0, 1, 1], [], []>} : vector<8x64xf32>, vector<64x128xf32>, vector<8x128xf32> -> vector<8x128xf32>
    %31 = arith.addf %30, %2 : vector<8x128xf32>
    %32 = vector.extract_strided_slice %31 {offsets = [0, 0], sizes = [8, 96], strides = [1, 1]} : vector<8x128xf32> to vector<8x96xf32>
    %33 = arith.negf %32 : vector<8x96xf32>
    %34 = math.exp %33 : vector<8x96xf32>
    %cst_15 = arith.constant 1.000000e+00 : f32
    %35 = vector.broadcast %cst_15 : f32 to vector<8x96xf32>
    %36 = arith.addf %35, %34 : vector<8x96xf32>
    %37 = arith.divf %35, %36 : vector<8x96xf32>
    %38 = vector.extract_strided_slice %31 {offsets = [0, 96], sizes = [8, 32], strides = [1, 1]} : vector<8x128xf32> to vector<8x32xf32>
    %39 = math.tanh %38 : vector<8x32xf32>
    %40 = vector.extract_strided_slice %37 {offsets = [0, 0], sizes = [8, 32], strides = [1, 1]} : vector<8x96xf32> to vector<8x32xf32>
    %41 = vector.extract_strided_slice %37 {offsets = [0, 32], sizes = [8, 32], strides = [1, 1]} : vector<8x96xf32> to vector<8x32xf32>
    %42 = vector.extract_strided_slice %37 {offsets = [0, 64], sizes = [8, 32], strides = [1, 1]} : vector<8x96xf32> to vector<8x32xf32>
    %43 = arith.mulf %41, %9 : vector<8x32xf32>
    %44 = arith.mulf %40, %39 : vector<8x32xf32>
    %45 = arith.addf %43, %44 : vector<8x32xf32>
    %46 = math.tanh %45 : vector<8x32xf32>
    %47 = arith.mulf %42, %46 : vector<8x32xf32>
    %c0_16 = arith.constant 0 : index
    %c0_17 = arith.constant 0 : index
    %c0_18 = arith.constant 0 : index
    %48 = vector.load %arg6[%c0_16, %c0_17, %c0_18] : memref<8x8x32xf32, #tpu.memory_space<vmem>>, vector<1x8x32xf32>
    %49 = vector.shape_cast %48 : vector<1x8x32xf32> to vector<8x32xf32>
    %50 = arith.mulf %47, %49 : vector<8x32xf32>
    %51 = arith.addf %9, %50 : vector<8x32xf32>
    %52 = vector.extract_strided_slice %8 {offsets = [8, 0], sizes = [8, 128], strides = [1, 1]} : vector<64x128xf32> to vector<8x128xf32>
    %cst_19 = arith.constant dense<0.000000e+00> : vector<8x128xf32>
    %53 = tpu.matmul %28, %0, %cst_19 {dimension_numbers = #tpu.dot_dimension_numbers<[1], [0], [0], [1], [0, 0, 1, 1], [], []>} : vector<8x32xf32>, vector<32x128xf32>, vector<8x128xf32> -> vector<8x128xf32>
    %54 = arith.addf %52, %53 : vector<8x128xf32>
    %55 = vector.extract_strided_slice %54 {offsets = [0, 0], sizes = [8, 96], strides = [1, 1]} : vector<8x128xf32> to vector<8x96xf32>
    %56 = arith.negf %55 : vector<8x96xf32>
    %57 = math.exp %56 : vector<8x96xf32>
    %cst_20 = arith.constant 1.000000e+00 : f32
    %58 = vector.broadcast %cst_20 : f32 to vector<8x96xf32>
    %59 = arith.addf %58, %57 : vector<8x96xf32>
    %60 = arith.divf %58, %59 : vector<8x96xf32>
    %61 = vector.extract_strided_slice %54 {offsets = [0, 96], sizes = [8, 32], strides = [1, 1]} : vector<8x128xf32> to vector<8x32xf32>
    %62 = math.tanh %61 : vector<8x32xf32>
    %63 = vector.extract_strided_slice %60 {offsets = [0, 0], sizes = [8, 32], strides = [1, 1]} : vector<8x96xf32> to vector<8x32xf32>
    %64 = vector.extract_strided_slice %60 {offsets = [0, 32], sizes = [8, 32], strides = [1, 1]} : vector<8x96xf32> to vector<8x32xf32>
    %65 = vector.extract_strided_slice %60 {offsets = [0, 64], sizes = [8, 32], strides = [1, 1]} : vector<8x96xf32> to vector<8x32xf32>
    %66 = arith.mulf %64, %26 : vector<8x32xf32>
    %67 = arith.mulf %63, %62 : vector<8x32xf32>
    %68 = arith.addf %66, %67 : vector<8x32xf32>
    %69 = math.tanh %68 : vector<8x32xf32>
    %70 = arith.mulf %65, %69 : vector<8x32xf32>
    %71 = tpu.concatenate %70, %47 in 1 : vector<8x32xf32>, vector<8x32xf32> -> vector<8x64xf32>
    %cst_21 = arith.constant dense<0.000000e+00> : vector<8x128xf32>
    %72 = tpu.matmul %71, %1, %cst_21 {dimension_numbers = #tpu.dot_dimension_numbers<[1], [0], [0], [1], [0, 0, 1, 1], [], []>} : vector<8x64xf32>, vector<64x128xf32>, vector<8x128xf32> -> vector<8x128xf32>
    %73 = arith.addf %72, %2 : vector<8x128xf32>
    %74 = vector.extract_strided_slice %73 {offsets = [0, 0], sizes = [8, 96], strides = [1, 1]} : vector<8x128xf32> to vector<8x96xf32>
    %75 = arith.negf %74 : vector<8x96xf32>
    %76 = math.exp %75 : vector<8x96xf32>
    %cst_22 = arith.constant 1.000000e+00 : f32
    %77 = vector.broadcast %cst_22 : f32 to vector<8x96xf32>
    %78 = arith.addf %77, %76 : vector<8x96xf32>
    %79 = arith.divf %77, %78 : vector<8x96xf32>
    %80 = vector.extract_strided_slice %73 {offsets = [0, 96], sizes = [8, 32], strides = [1, 1]} : vector<8x128xf32> to vector<8x32xf32>
    %81 = math.tanh %80 : vector<8x32xf32>
    %82 = vector.extract_strided_slice %79 {offsets = [0, 0], sizes = [8, 32], strides = [1, 1]} : vector<8x96xf32> to vector<8x32xf32>
    %83 = vector.extract_strided_slice %79 {offsets = [0, 32], sizes = [8, 32], strides = [1, 1]} : vector<8x96xf32> to vector<8x32xf32>
    %84 = vector.extract_strided_slice %79 {offsets = [0, 64], sizes = [8, 32], strides = [1, 1]} : vector<8x96xf32> to vector<8x32xf32>
    %85 = arith.mulf %83, %45 : vector<8x32xf32>
    %86 = arith.mulf %82, %81 : vector<8x32xf32>
    %87 = arith.addf %85, %86 : vector<8x32xf32>
    %88 = math.tanh %87 : vector<8x32xf32>
    %89 = arith.mulf %84, %88 : vector<8x32xf32>
    %c1 = arith.constant 1 : index
    %c0_23 = arith.constant 0 : index
    %c0_24 = arith.constant 0 : index
    %90 = vector.load %arg6[%c1, %c0_23, %c0_24] : memref<8x8x32xf32, #tpu.memory_space<vmem>>, vector<1x8x32xf32>
    %91 = vector.shape_cast %90 : vector<1x8x32xf32> to vector<8x32xf32>
    %92 = arith.mulf %89, %91 : vector<8x32xf32>
    %93 = arith.addf %51, %92 : vector<8x32xf32>
    %94 = vector.extract_strided_slice %8 {offsets = [16, 0], sizes = [8, 128], strides = [1, 1]} : vector<64x128xf32> to vector<8x128xf32>
    %cst_25 = arith.constant dense<0.000000e+00> : vector<8x128xf32>
    %95 = tpu.matmul %70, %0, %cst_25 {dimension_numbers = #tpu.dot_dimension_numbers<[1], [0], [0], [1], [0, 0, 1, 1], [], []>} : vector<8x32xf32>, vector<32x128xf32>, vector<8x128xf32> -> vector<8x128xf32>
    %96 = arith.addf %94, %95 : vector<8x128xf32>
    %97 = vector.extract_strided_slice %96 {offsets = [0, 0], sizes = [8, 96], strides = [1, 1]} : vector<8x128xf32> to vector<8x96xf32>
    %98 = arith.negf %97 : vector<8x96xf32>
    %99 = math.exp %98 : vector<8x96xf32>
    %cst_26 = arith.constant 1.000000e+00 : f32
    %100 = vector.broadcast %cst_26 : f32 to vector<8x96xf32>
    %101 = arith.addf %100, %99 : vector<8x96xf32>
    %102 = arith.divf %100, %101 : vector<8x96xf32>
    %103 = vector.extract_strided_slice %96 {offsets = [0, 96], sizes = [8, 32], strides = [1, 1]} : vector<8x128xf32> to vector<8x32xf32>
    %104 = math.tanh %103 : vector<8x32xf32>
    %105 = vector.extract_strided_slice %102 {offsets = [0, 0], sizes = [8, 32], strides = [1, 1]} : vector<8x96xf32> to vector<8x32xf32>
    %106 = vector.extract_strided_slice %102 {offsets = [0, 32], sizes = [8, 32], strides = [1, 1]} : vector<8x96xf32> to vector<8x32xf32>
    %107 = vector.extract_strided_slice %102 {offsets = [0, 64], sizes = [8, 32], strides = [1, 1]} : vector<8x96xf32> to vector<8x32xf32>
    %108 = arith.mulf %106, %68 : vector<8x32xf32>
    %109 = arith.mulf %105, %104 : vector<8x32xf32>
    %110 = arith.addf %108, %109 : vector<8x32xf32>
    %111 = math.tanh %110 : vector<8x32xf32>
    %112 = arith.mulf %107, %111 : vector<8x32xf32>
    %113 = tpu.concatenate %112, %89 in 1 : vector<8x32xf32>, vector<8x32xf32> -> vector<8x64xf32>
    %cst_27 = arith.constant dense<0.000000e+00> : vector<8x128xf32>
    %114 = tpu.matmul %113, %1, %cst_27 {dimension_numbers = #tpu.dot_dimension_numbers<[1], [0], [0], [1], [0, 0, 1, 1], [], []>} : vector<8x64xf32>, vector<64x128xf32>, vector<8x128xf32> -> vector<8x128xf32>
    %115 = arith.addf %114, %2 : vector<8x128xf32>
    %116 = vector.extract_strided_slice %115 {offsets = [0, 0], sizes = [8, 96], strides = [1, 1]} : vector<8x128xf32> to vector<8x96xf32>
    %117 = arith.negf %116 : vector<8x96xf32>
    %118 = math.exp %117 : vector<8x96xf32>
    %cst_28 = arith.constant 1.000000e+00 : f32
    %119 = vector.broadcast %cst_28 : f32 to vector<8x96xf32>
    %120 = arith.addf %119, %118 : vector<8x96xf32>
    %121 = arith.divf %119, %120 : vector<8x96xf32>
    %122 = vector.extract_strided_slice %115 {offsets = [0, 96], sizes = [8, 32], strides = [1, 1]} : vector<8x128xf32> to vector<8x32xf32>
    %123 = math.tanh %122 : vector<8x32xf32>
    %124 = vector.extract_strided_slice %121 {offsets = [0, 0], sizes = [8, 32], strides = [1, 1]} : vector<8x96xf32> to vector<8x32xf32>
    %125 = vector.extract_strided_slice %121 {offsets = [0, 32], sizes = [8, 32], strides = [1, 1]} : vector<8x96xf32> to vector<8x32xf32>
    %126 = vector.extract_strided_slice %121 {offsets = [0, 64], sizes = [8, 32], strides = [1, 1]} : vector<8x96xf32> to vector<8x32xf32>
    %127 = arith.mulf %125, %87 : vector<8x32xf32>
    %128 = arith.mulf %124, %123 : vector<8x32xf32>
    %129 = arith.addf %127, %128 : vector<8x32xf32>
    %130 = math.tanh %129 : vector<8x32xf32>
    %131 = arith.mulf %126, %130 : vector<8x32xf32>
    %c2 = arith.constant 2 : index
    %c0_29 = arith.constant 0 : index
    %c0_30 = arith.constant 0 : index
    %132 = vector.load %arg6[%c2, %c0_29, %c0_30] : memref<8x8x32xf32, #tpu.memory_space<vmem>>, vector<1x8x32xf32>
    %133 = vector.shape_cast %132 : vector<1x8x32xf32> to vector<8x32xf32>
    %134 = arith.mulf %131, %133 : vector<8x32xf32>
    %135 = arith.addf %93, %134 : vector<8x32xf32>
    %136 = vector.extract_strided_slice %8 {offsets = [24, 0], sizes = [8, 128], strides = [1, 1]} : vector<64x128xf32> to vector<8x128xf32>
    %cst_31 = arith.constant dense<0.000000e+00> : vector<8x128xf32>
    %137 = tpu.matmul %112, %0, %cst_31 {dimension_numbers = #tpu.dot_dimension_numbers<[1], [0], [0], [1], [0, 0, 1, 1], [], []>} : vector<8x32xf32>, vector<32x128xf32>, vector<8x128xf32> -> vector<8x128xf32>
    %138 = arith.addf %136, %137 : vector<8x128xf32>
    %139 = vector.extract_strided_slice %138 {offsets = [0, 0], sizes = [8, 96], strides = [1, 1]} : vector<8x128xf32> to vector<8x96xf32>
    %140 = arith.negf %139 : vector<8x96xf32>
    %141 = math.exp %140 : vector<8x96xf32>
    %cst_32 = arith.constant 1.000000e+00 : f32
    %142 = vector.broadcast %cst_32 : f32 to vector<8x96xf32>
    %143 = arith.addf %142, %141 : vector<8x96xf32>
    %144 = arith.divf %142, %143 : vector<8x96xf32>
    %145 = vector.extract_strided_slice %138 {offsets = [0, 96], sizes = [8, 32], strides = [1, 1]} : vector<8x128xf32> to vector<8x32xf32>
    %146 = math.tanh %145 : vector<8x32xf32>
    %147 = vector.extract_strided_slice %144 {offsets = [0, 0], sizes = [8, 32], strides = [1, 1]} : vector<8x96xf32> to vector<8x32xf32>
    %148 = vector.extract_strided_slice %144 {offsets = [0, 32], sizes = [8, 32], strides = [1, 1]} : vector<8x96xf32> to vector<8x32xf32>
    %149 = vector.extract_strided_slice %144 {offsets = [0, 64], sizes = [8, 32], strides = [1, 1]} : vector<8x96xf32> to vector<8x32xf32>
    %150 = arith.mulf %148, %110 : vector<8x32xf32>
    %151 = arith.mulf %147, %146 : vector<8x32xf32>
    %152 = arith.addf %150, %151 : vector<8x32xf32>
    %153 = math.tanh %152 : vector<8x32xf32>
    %154 = arith.mulf %149, %153 : vector<8x32xf32>
    %155 = tpu.concatenate %154, %131 in 1 : vector<8x32xf32>, vector<8x32xf32> -> vector<8x64xf32>
    %cst_33 = arith.constant dense<0.000000e+00> : vector<8x128xf32>
    %156 = tpu.matmul %155, %1, %cst_33 {dimension_numbers = #tpu.dot_dimension_numbers<[1], [0], [0], [1], [0, 0, 1, 1], [], []>} : vector<8x64xf32>, vector<64x128xf32>, vector<8x128xf32> -> vector<8x128xf32>
    %157 = arith.addf %156, %2 : vector<8x128xf32>
    %158 = vector.extract_strided_slice %157 {offsets = [0, 0], sizes = [8, 96], strides = [1, 1]} : vector<8x128xf32> to vector<8x96xf32>
    %159 = arith.negf %158 : vector<8x96xf32>
    %160 = math.exp %159 : vector<8x96xf32>
    %cst_34 = arith.constant 1.000000e+00 : f32
    %161 = vector.broadcast %cst_34 : f32 to vector<8x96xf32>
    %162 = arith.addf %161, %160 : vector<8x96xf32>
    %163 = arith.divf %161, %162 : vector<8x96xf32>
    %164 = vector.extract_strided_slice %157 {offsets = [0, 96], sizes = [8, 32], strides = [1, 1]} : vector<8x128xf32> to vector<8x32xf32>
    %165 = math.tanh %164 : vector<8x32xf32>
    %166 = vector.extract_strided_slice %163 {offsets = [0, 0], sizes = [8, 32], strides = [1, 1]} : vector<8x96xf32> to vector<8x32xf32>
    %167 = vector.extract_strided_slice %163 {offsets = [0, 32], sizes = [8, 32], strides = [1, 1]} : vector<8x96xf32> to vector<8x32xf32>
    %168 = vector.extract_strided_slice %163 {offsets = [0, 64], sizes = [8, 32], strides = [1, 1]} : vector<8x96xf32> to vector<8x32xf32>
    %169 = arith.mulf %167, %129 : vector<8x32xf32>
    %170 = arith.mulf %166, %165 : vector<8x32xf32>
    %171 = arith.addf %169, %170 : vector<8x32xf32>
    %172 = math.tanh %171 : vector<8x32xf32>
    %173 = arith.mulf %168, %172 : vector<8x32xf32>
    %c3 = arith.constant 3 : index
    %c0_35 = arith.constant 0 : index
    %c0_36 = arith.constant 0 : index
    %174 = vector.load %arg6[%c3, %c0_35, %c0_36] : memref<8x8x32xf32, #tpu.memory_space<vmem>>, vector<1x8x32xf32>
    %175 = vector.shape_cast %174 : vector<1x8x32xf32> to vector<8x32xf32>
    %176 = arith.mulf %173, %175 : vector<8x32xf32>
    %177 = arith.addf %135, %176 : vector<8x32xf32>
    %178 = vector.extract_strided_slice %8 {offsets = [32, 0], sizes = [8, 128], strides = [1, 1]} : vector<64x128xf32> to vector<8x128xf32>
    %cst_37 = arith.constant dense<0.000000e+00> : vector<8x128xf32>
    %179 = tpu.matmul %154, %0, %cst_37 {dimension_numbers = #tpu.dot_dimension_numbers<[1], [0], [0], [1], [0, 0, 1, 1], [], []>} : vector<8x32xf32>, vector<32x128xf32>, vector<8x128xf32> -> vector<8x128xf32>
    %180 = arith.addf %178, %179 : vector<8x128xf32>
    %181 = vector.extract_strided_slice %180 {offsets = [0, 0], sizes = [8, 96], strides = [1, 1]} : vector<8x128xf32> to vector<8x96xf32>
    %182 = arith.negf %181 : vector<8x96xf32>
    %183 = math.exp %182 : vector<8x96xf32>
    %cst_38 = arith.constant 1.000000e+00 : f32
    %184 = vector.broadcast %cst_38 : f32 to vector<8x96xf32>
    %185 = arith.addf %184, %183 : vector<8x96xf32>
    %186 = arith.divf %184, %185 : vector<8x96xf32>
    %187 = vector.extract_strided_slice %180 {offsets = [0, 96], sizes = [8, 32], strides = [1, 1]} : vector<8x128xf32> to vector<8x32xf32>
    %188 = math.tanh %187 : vector<8x32xf32>
    %189 = vector.extract_strided_slice %186 {offsets = [0, 0], sizes = [8, 32], strides = [1, 1]} : vector<8x96xf32> to vector<8x32xf32>
    %190 = vector.extract_strided_slice %186 {offsets = [0, 32], sizes = [8, 32], strides = [1, 1]} : vector<8x96xf32> to vector<8x32xf32>
    %191 = vector.extract_strided_slice %186 {offsets = [0, 64], sizes = [8, 32], strides = [1, 1]} : vector<8x96xf32> to vector<8x32xf32>
    %192 = arith.mulf %190, %152 : vector<8x32xf32>
    %193 = arith.mulf %189, %188 : vector<8x32xf32>
    %194 = arith.addf %192, %193 : vector<8x32xf32>
    %195 = math.tanh %194 : vector<8x32xf32>
    %196 = arith.mulf %191, %195 : vector<8x32xf32>
    %197 = tpu.concatenate %196, %173 in 1 : vector<8x32xf32>, vector<8x32xf32> -> vector<8x64xf32>
    %cst_39 = arith.constant dense<0.000000e+00> : vector<8x128xf32>
    %198 = tpu.matmul %197, %1, %cst_39 {dimension_numbers = #tpu.dot_dimension_numbers<[1], [0], [0], [1], [0, 0, 1, 1], [], []>} : vector<8x64xf32>, vector<64x128xf32>, vector<8x128xf32> -> vector<8x128xf32>
    %199 = arith.addf %198, %2 : vector<8x128xf32>
    %200 = vector.extract_strided_slice %199 {offsets = [0, 0], sizes = [8, 96], strides = [1, 1]} : vector<8x128xf32> to vector<8x96xf32>
    %201 = arith.negf %200 : vector<8x96xf32>
    %202 = math.exp %201 : vector<8x96xf32>
    %cst_40 = arith.constant 1.000000e+00 : f32
    %203 = vector.broadcast %cst_40 : f32 to vector<8x96xf32>
    %204 = arith.addf %203, %202 : vector<8x96xf32>
    %205 = arith.divf %203, %204 : vector<8x96xf32>
    %206 = vector.extract_strided_slice %199 {offsets = [0, 96], sizes = [8, 32], strides = [1, 1]} : vector<8x128xf32> to vector<8x32xf32>
    %207 = math.tanh %206 : vector<8x32xf32>
    %208 = vector.extract_strided_slice %205 {offsets = [0, 0], sizes = [8, 32], strides = [1, 1]} : vector<8x96xf32> to vector<8x32xf32>
    %209 = vector.extract_strided_slice %205 {offsets = [0, 32], sizes = [8, 32], strides = [1, 1]} : vector<8x96xf32> to vector<8x32xf32>
    %210 = vector.extract_strided_slice %205 {offsets = [0, 64], sizes = [8, 32], strides = [1, 1]} : vector<8x96xf32> to vector<8x32xf32>
    %211 = arith.mulf %209, %171 : vector<8x32xf32>
    %212 = arith.mulf %208, %207 : vector<8x32xf32>
    %213 = arith.addf %211, %212 : vector<8x32xf32>
    %214 = math.tanh %213 : vector<8x32xf32>
    %215 = arith.mulf %210, %214 : vector<8x32xf32>
    %c4 = arith.constant 4 : index
    %c0_41 = arith.constant 0 : index
    %c0_42 = arith.constant 0 : index
    %216 = vector.load %arg6[%c4, %c0_41, %c0_42] : memref<8x8x32xf32, #tpu.memory_space<vmem>>, vector<1x8x32xf32>
    %217 = vector.shape_cast %216 : vector<1x8x32xf32> to vector<8x32xf32>
    %218 = arith.mulf %215, %217 : vector<8x32xf32>
    %219 = arith.addf %177, %218 : vector<8x32xf32>
    %220 = vector.extract_strided_slice %8 {offsets = [40, 0], sizes = [8, 128], strides = [1, 1]} : vector<64x128xf32> to vector<8x128xf32>
    %cst_43 = arith.constant dense<0.000000e+00> : vector<8x128xf32>
    %221 = tpu.matmul %196, %0, %cst_43 {dimension_numbers = #tpu.dot_dimension_numbers<[1], [0], [0], [1], [0, 0, 1, 1], [], []>} : vector<8x32xf32>, vector<32x128xf32>, vector<8x128xf32> -> vector<8x128xf32>
    %222 = arith.addf %220, %221 : vector<8x128xf32>
    %223 = vector.extract_strided_slice %222 {offsets = [0, 0], sizes = [8, 96], strides = [1, 1]} : vector<8x128xf32> to vector<8x96xf32>
    %224 = arith.negf %223 : vector<8x96xf32>
    %225 = math.exp %224 : vector<8x96xf32>
    %cst_44 = arith.constant 1.000000e+00 : f32
    %226 = vector.broadcast %cst_44 : f32 to vector<8x96xf32>
    %227 = arith.addf %226, %225 : vector<8x96xf32>
    %228 = arith.divf %226, %227 : vector<8x96xf32>
    %229 = vector.extract_strided_slice %222 {offsets = [0, 96], sizes = [8, 32], strides = [1, 1]} : vector<8x128xf32> to vector<8x32xf32>
    %230 = math.tanh %229 : vector<8x32xf32>
    %231 = vector.extract_strided_slice %228 {offsets = [0, 0], sizes = [8, 32], strides = [1, 1]} : vector<8x96xf32> to vector<8x32xf32>
    %232 = vector.extract_strided_slice %228 {offsets = [0, 32], sizes = [8, 32], strides = [1, 1]} : vector<8x96xf32> to vector<8x32xf32>
    %233 = vector.extract_strided_slice %228 {offsets = [0, 64], sizes = [8, 32], strides = [1, 1]} : vector<8x96xf32> to vector<8x32xf32>
    %234 = arith.mulf %232, %194 : vector<8x32xf32>
    %235 = arith.mulf %231, %230 : vector<8x32xf32>
    %236 = arith.addf %234, %235 : vector<8x32xf32>
    %237 = math.tanh %236 : vector<8x32xf32>
    %238 = arith.mulf %233, %237 : vector<8x32xf32>
    %239 = tpu.concatenate %238, %215 in 1 : vector<8x32xf32>, vector<8x32xf32> -> vector<8x64xf32>
    %cst_45 = arith.constant dense<0.000000e+00> : vector<8x128xf32>
    %240 = tpu.matmul %239, %1, %cst_45 {dimension_numbers = #tpu.dot_dimension_numbers<[1], [0], [0], [1], [0, 0, 1, 1], [], []>} : vector<8x64xf32>, vector<64x128xf32>, vector<8x128xf32> -> vector<8x128xf32>
    %241 = arith.addf %240, %2 : vector<8x128xf32>
    %242 = vector.extract_strided_slice %241 {offsets = [0, 0], sizes = [8, 96], strides = [1, 1]} : vector<8x128xf32> to vector<8x96xf32>
    %243 = arith.negf %242 : vector<8x96xf32>
    %244 = math.exp %243 : vector<8x96xf32>
    %cst_46 = arith.constant 1.000000e+00 : f32
    %245 = vector.broadcast %cst_46 : f32 to vector<8x96xf32>
    %246 = arith.addf %245, %244 : vector<8x96xf32>
    %247 = arith.divf %245, %246 : vector<8x96xf32>
    %248 = vector.extract_strided_slice %241 {offsets = [0, 96], sizes = [8, 32], strides = [1, 1]} : vector<8x128xf32> to vector<8x32xf32>
    %249 = math.tanh %248 : vector<8x32xf32>
    %250 = vector.extract_strided_slice %247 {offsets = [0, 0], sizes = [8, 32], strides = [1, 1]} : vector<8x96xf32> to vector<8x32xf32>
    %251 = vector.extract_strided_slice %247 {offsets = [0, 32], sizes = [8, 32], strides = [1, 1]} : vector<8x96xf32> to vector<8x32xf32>
    %252 = vector.extract_strided_slice %247 {offsets = [0, 64], sizes = [8, 32], strides = [1, 1]} : vector<8x96xf32> to vector<8x32xf32>
    %253 = arith.mulf %251, %213 : vector<8x32xf32>
    %254 = arith.mulf %250, %249 : vector<8x32xf32>
    %255 = arith.addf %253, %254 : vector<8x32xf32>
    %256 = math.tanh %255 : vector<8x32xf32>
    %257 = arith.mulf %252, %256 : vector<8x32xf32>
    %c5 = arith.constant 5 : index
    %c0_47 = arith.constant 0 : index
    %c0_48 = arith.constant 0 : index
    %258 = vector.load %arg6[%c5, %c0_47, %c0_48] : memref<8x8x32xf32, #tpu.memory_space<vmem>>, vector<1x8x32xf32>
    %259 = vector.shape_cast %258 : vector<1x8x32xf32> to vector<8x32xf32>
    %260 = arith.mulf %257, %259 : vector<8x32xf32>
    %261 = arith.addf %219, %260 : vector<8x32xf32>
    %262 = vector.extract_strided_slice %8 {offsets = [48, 0], sizes = [8, 128], strides = [1, 1]} : vector<64x128xf32> to vector<8x128xf32>
    %cst_49 = arith.constant dense<0.000000e+00> : vector<8x128xf32>
    %263 = tpu.matmul %238, %0, %cst_49 {dimension_numbers = #tpu.dot_dimension_numbers<[1], [0], [0], [1], [0, 0, 1, 1], [], []>} : vector<8x32xf32>, vector<32x128xf32>, vector<8x128xf32> -> vector<8x128xf32>
    %264 = arith.addf %262, %263 : vector<8x128xf32>
    %265 = vector.extract_strided_slice %264 {offsets = [0, 0], sizes = [8, 96], strides = [1, 1]} : vector<8x128xf32> to vector<8x96xf32>
    %266 = arith.negf %265 : vector<8x96xf32>
    %267 = math.exp %266 : vector<8x96xf32>
    %cst_50 = arith.constant 1.000000e+00 : f32
    %268 = vector.broadcast %cst_50 : f32 to vector<8x96xf32>
    %269 = arith.addf %268, %267 : vector<8x96xf32>
    %270 = arith.divf %268, %269 : vector<8x96xf32>
    %271 = vector.extract_strided_slice %264 {offsets = [0, 96], sizes = [8, 32], strides = [1, 1]} : vector<8x128xf32> to vector<8x32xf32>
    %272 = math.tanh %271 : vector<8x32xf32>
    %273 = vector.extract_strided_slice %270 {offsets = [0, 0], sizes = [8, 32], strides = [1, 1]} : vector<8x96xf32> to vector<8x32xf32>
    %274 = vector.extract_strided_slice %270 {offsets = [0, 32], sizes = [8, 32], strides = [1, 1]} : vector<8x96xf32> to vector<8x32xf32>
    %275 = vector.extract_strided_slice %270 {offsets = [0, 64], sizes = [8, 32], strides = [1, 1]} : vector<8x96xf32> to vector<8x32xf32>
    %276 = arith.mulf %274, %236 : vector<8x32xf32>
    %277 = arith.mulf %273, %272 : vector<8x32xf32>
    %278 = arith.addf %276, %277 : vector<8x32xf32>
    %279 = math.tanh %278 : vector<8x32xf32>
    %280 = arith.mulf %275, %279 : vector<8x32xf32>
    %281 = tpu.concatenate %280, %257 in 1 : vector<8x32xf32>, vector<8x32xf32> -> vector<8x64xf32>
    %cst_51 = arith.constant dense<0.000000e+00> : vector<8x128xf32>
    %282 = tpu.matmul %281, %1, %cst_51 {dimension_numbers = #tpu.dot_dimension_numbers<[1], [0], [0], [1], [0, 0, 1, 1], [], []>} : vector<8x64xf32>, vector<64x128xf32>, vector<8x128xf32> -> vector<8x128xf32>
    %283 = arith.addf %282, %2 : vector<8x128xf32>
    %284 = vector.extract_strided_slice %283 {offsets = [0, 0], sizes = [8, 96], strides = [1, 1]} : vector<8x128xf32> to vector<8x96xf32>
    %285 = arith.negf %284 : vector<8x96xf32>
    %286 = math.exp %285 : vector<8x96xf32>
    %cst_52 = arith.constant 1.000000e+00 : f32
    %287 = vector.broadcast %cst_52 : f32 to vector<8x96xf32>
    %288 = arith.addf %287, %286 : vector<8x96xf32>
    %289 = arith.divf %287, %288 : vector<8x96xf32>
    %290 = vector.extract_strided_slice %283 {offsets = [0, 96], sizes = [8, 32], strides = [1, 1]} : vector<8x128xf32> to vector<8x32xf32>
    %291 = math.tanh %290 : vector<8x32xf32>
    %292 = vector.extract_strided_slice %289 {offsets = [0, 0], sizes = [8, 32], strides = [1, 1]} : vector<8x96xf32> to vector<8x32xf32>
    %293 = vector.extract_strided_slice %289 {offsets = [0, 32], sizes = [8, 32], strides = [1, 1]} : vector<8x96xf32> to vector<8x32xf32>
    %294 = vector.extract_strided_slice %289 {offsets = [0, 64], sizes = [8, 32], strides = [1, 1]} : vector<8x96xf32> to vector<8x32xf32>
    %295 = arith.mulf %293, %255 : vector<8x32xf32>
    %296 = arith.mulf %292, %291 : vector<8x32xf32>
    %297 = arith.addf %295, %296 : vector<8x32xf32>
    %298 = math.tanh %297 : vector<8x32xf32>
    %299 = arith.mulf %294, %298 : vector<8x32xf32>
    %c6 = arith.constant 6 : index
    %c0_53 = arith.constant 0 : index
    %c0_54 = arith.constant 0 : index
    %300 = vector.load %arg6[%c6, %c0_53, %c0_54] : memref<8x8x32xf32, #tpu.memory_space<vmem>>, vector<1x8x32xf32>
    %301 = vector.shape_cast %300 : vector<1x8x32xf32> to vector<8x32xf32>
    %302 = arith.mulf %299, %301 : vector<8x32xf32>
    %303 = arith.addf %261, %302 : vector<8x32xf32>
    %304 = vector.extract_strided_slice %8 {offsets = [56, 0], sizes = [8, 128], strides = [1, 1]} : vector<64x128xf32> to vector<8x128xf32>
    %cst_55 = arith.constant dense<0.000000e+00> : vector<8x128xf32>
    %305 = tpu.matmul %280, %0, %cst_55 {dimension_numbers = #tpu.dot_dimension_numbers<[1], [0], [0], [1], [0, 0, 1, 1], [], []>} : vector<8x32xf32>, vector<32x128xf32>, vector<8x128xf32> -> vector<8x128xf32>
    %306 = arith.addf %304, %305 : vector<8x128xf32>
    %307 = vector.extract_strided_slice %306 {offsets = [0, 0], sizes = [8, 96], strides = [1, 1]} : vector<8x128xf32> to vector<8x96xf32>
    %308 = arith.negf %307 : vector<8x96xf32>
    %309 = math.exp %308 : vector<8x96xf32>
    %cst_56 = arith.constant 1.000000e+00 : f32
    %310 = vector.broadcast %cst_56 : f32 to vector<8x96xf32>
    %311 = arith.addf %310, %309 : vector<8x96xf32>
    %312 = arith.divf %310, %311 : vector<8x96xf32>
    %313 = vector.extract_strided_slice %306 {offsets = [0, 96], sizes = [8, 32], strides = [1, 1]} : vector<8x128xf32> to vector<8x32xf32>
    %314 = math.tanh %313 : vector<8x32xf32>
    %315 = vector.extract_strided_slice %312 {offsets = [0, 0], sizes = [8, 32], strides = [1, 1]} : vector<8x96xf32> to vector<8x32xf32>
    %316 = vector.extract_strided_slice %312 {offsets = [0, 32], sizes = [8, 32], strides = [1, 1]} : vector<8x96xf32> to vector<8x32xf32>
    %317 = vector.extract_strided_slice %312 {offsets = [0, 64], sizes = [8, 32], strides = [1, 1]} : vector<8x96xf32> to vector<8x32xf32>
    %318 = arith.mulf %316, %278 : vector<8x32xf32>
    %319 = arith.mulf %315, %314 : vector<8x32xf32>
    %320 = arith.addf %318, %319 : vector<8x32xf32>
    %321 = math.tanh %320 : vector<8x32xf32>
    %322 = arith.mulf %317, %321 : vector<8x32xf32>
    %323 = tpu.concatenate %322, %299 in 1 : vector<8x32xf32>, vector<8x32xf32> -> vector<8x64xf32>
    %cst_57 = arith.constant dense<0.000000e+00> : vector<8x128xf32>
    %324 = tpu.matmul %323, %1, %cst_57 {dimension_numbers = #tpu.dot_dimension_numbers<[1], [0], [0], [1], [0, 0, 1, 1], [], []>} : vector<8x64xf32>, vector<64x128xf32>, vector<8x128xf32> -> vector<8x128xf32>
    %325 = arith.addf %324, %2 : vector<8x128xf32>
    %326 = vector.extract_strided_slice %325 {offsets = [0, 0], sizes = [8, 96], strides = [1, 1]} : vector<8x128xf32> to vector<8x96xf32>
    %327 = arith.negf %326 : vector<8x96xf32>
    %328 = math.exp %327 : vector<8x96xf32>
    %cst_58 = arith.constant 1.000000e+00 : f32
    %329 = vector.broadcast %cst_58 : f32 to vector<8x96xf32>
    %330 = arith.addf %329, %328 : vector<8x96xf32>
    %331 = arith.divf %329, %330 : vector<8x96xf32>
    %332 = vector.extract_strided_slice %325 {offsets = [0, 96], sizes = [8, 32], strides = [1, 1]} : vector<8x128xf32> to vector<8x32xf32>
    %333 = math.tanh %332 : vector<8x32xf32>
    %334 = vector.extract_strided_slice %331 {offsets = [0, 0], sizes = [8, 32], strides = [1, 1]} : vector<8x96xf32> to vector<8x32xf32>
    %335 = vector.extract_strided_slice %331 {offsets = [0, 32], sizes = [8, 32], strides = [1, 1]} : vector<8x96xf32> to vector<8x32xf32>
    %336 = vector.extract_strided_slice %331 {offsets = [0, 64], sizes = [8, 32], strides = [1, 1]} : vector<8x96xf32> to vector<8x32xf32>
    %337 = arith.mulf %335, %297 : vector<8x32xf32>
    %338 = arith.mulf %334, %333 : vector<8x32xf32>
    %339 = arith.addf %337, %338 : vector<8x32xf32>
    %340 = math.tanh %339 : vector<8x32xf32>
    %341 = arith.mulf %336, %340 : vector<8x32xf32>
    %c7 = arith.constant 7 : index
    %c0_59 = arith.constant 0 : index
    %c0_60 = arith.constant 0 : index
    %342 = vector.load %arg6[%c7, %c0_59, %c0_60] : memref<8x8x32xf32, #tpu.memory_space<vmem>>, vector<1x8x32xf32>
    %343 = vector.shape_cast %342 : vector<1x8x32xf32> to vector<8x32xf32>
    %344 = arith.mulf %341, %343 : vector<8x32xf32>
    %345 = arith.addf %303, %344 : vector<8x32xf32>
    %cst_61 = arith.constant dense<0.000000e+00> : vector<8xf32>
    %346 = vector.multi_reduction <add>, %345, %cst_61 [1] : vector<8x32xf32> to vector<8xf32>
    %347 = vector.shape_cast %346 : vector<8xf32> to vector<8x1xf32>
    %c0_62 = arith.constant 0 : index
    %c0_63 = arith.constant 0 : index
    %348 = vector.load %arg7[%c0_62, %c0_63] : memref<8x1xf32, #tpu.memory_space<vmem>>, vector<8x1xf32>
    tpu.vector_store %arg7[%c0_62, %c0_63], %347 {strides = array<i32>} : memref<8x1xf32, #tpu.memory_space<vmem>>, vector<8x1xf32>,
    return
  }
}

</mosaic_0001>

<bundles_post_ra>
// kernel: tpu_custom_call.1
= control target key start
LH: loop header
LB: loop body
LE: loop exit
PB: predicated region body
PF: predicated region fallthrough
CT: control target
= control target key end

     0   :  { %12 = vsyncpa [#allocation3], 0  ;;  %s3171_s0 = inlined_call_operand.vmem [shape: f32[64,13], index: 0, kind: input, shape index: {}]   ;;  %s3172_s1 = inlined_call_operand.vmem [shape: f32[13,128], index: 1, kind: input, shape index: {}]   ;;  %s3173_s2 = inlined_call_operand.hbm [shape: f32[32,128], index: 2, kind: input, shape index: {}]   ;;  %s3174_s3 = inlined_call_operand.vmem [shape: f32[1,128], index: 3, kind: input, shape index: {}]   ;;  %s3175_s4 = inlined_call_operand.vmem [shape: f32[64,128], index: 4, kind: input, shape index: {}]   ;;  %s3176_s5 = inlined_call_operand.vmem [shape: f32[8,128], index: 5, kind: input, shape index: {}]   ;;  %s3177_s6 = inlined_call_operand.hbm [shape: f32[8,8,32], index: 6, kind: input, shape index: {}]   ;;  %s3178_s7 = inlined_call_operand.vmem [shape: f32[8,1], index: 7, kind: output, shape index: {}]  }
   0x1   :  { %13 = vsyncpa [#allocation5], 0  ;;  %s2675_s24 = smov [#allocation2]   ;;  %s2627_s28 = scalar_lea.hbm %s3173_s2, 512 }
   0x2   :  { %s23_s25 = sshll.u32 %s2675_s24, 4  ;;  %p2628_p0 = scmp.ne.s32.totalorder %s3173_s2, %s2627_s28  ;;  %s24_s25 = int_to_ptr.vmem [resolvable:$true] %s23_s25 }
   0x3   :  { %p2631_p1 = scmp.lt.u32.totalorder %s2627_s28, %s3173_s2 }
   0x5   :  { %p2633_p2 = pnand %p2631_p1, %p2628_p0 }
   0x7   :  { %2636 = shalt.err (!%p2633_p2)
}
   0x8   :  { %s2637_s10 = scalar_lea.vmem %s24_s25, 512  ;;  %p2642_p4 = scmp.lt.s32.totalorder %s24_s25, %s24_s25 }
   0x9   :  { %p2638_p3 = scmp.ne.s32.totalorder %s24_s25, %s2637_s10  ;;  %p2643_p5 = scmp.lt.s32.totalorder %s2637_s10, %s2637_s10 }
   0xb   :  { %p2644_p6 = por %p2643_p5, %p2642_p4 }
   0xd   :  { %p2645_p7 = pnand %p2644_p6, %p2638_p3 }
   0xf   :  { %2648 = shalt.err (!%p2645_p7)
}
  0x10   :  { %s2676_s11 = smov 128   ;;  %s2677_s12 = smov 8  }
  0x11   :  { %29 = dma.hbm_to_vmem [thread:$0]  %s3173_s2, 512, %s24_s25, [#allocation3], %s2676_s11, %s2676_s11, %s2677_s12  }
  0x12   :  { %s2678_s15 = smov [#allocation4]   ;;  %s2649_s19 = scalar_lea.hbm %s3177_s6, 1024 }
  0x13   :  { %s41_s16 = sshll.u32 %s2678_s15, 4  ;;  %p2650_p8 = scmp.ne.s32.totalorder %s3177_s6, %s2649_s19  ;;  %s42_s16 = int_to_ptr.vmem [resolvable:$true] %s41_s16 }
  0x14   :  { %p2653_p9 = scmp.lt.u32.totalorder %s2649_s19, %s3177_s6 }
  0x16   :  { %p2655_p10 = pnand %p2653_p9, %p2650_p8 }
  0x18   :  { %2658 = shalt.err (!%p2655_p10)
}
  0x19   :  { %s2659_s24 = scalar_lea.vmem %s42_s16, 1024  ;;  %p2664_p12 = scmp.lt.s32.totalorder %s42_s16, %s42_s16 }
  0x1a   :  { %p2660_p11 = scmp.ne.s32.totalorder %s42_s16, %s2659_s24  ;;  %p2665_p13 = scmp.lt.s32.totalorder %s2659_s24, %s2659_s24 }
  0x1c   :  { %p2666_p0 = por %p2665_p13, %p2664_p12 }
  0x1e   :  { %p2667_p1 = pnand %p2666_p0, %p2660_p11 }
  0x20   :  { %2670 = shalt.err (!%p2667_p1)
}
  0x21   :  { %47 = dma.hbm_to_vmem [thread:$0]  %s3177_s6, 1024, %s42_s16, [#allocation5], %s2676_s11, %s2676_s11, %s2677_s12  }
  0x22   :  { %2671 = dma.done.wait [#allocation3], 512  }
  0x23   :  { %2672 = vsyncadd [#allocation3], 4294966784 }
  0x24   :  { %2673 = dma.done.wait [#allocation5], 1024  }
  0x25   :  { %2674 = vsyncadd [#allocation5], 4294966272  ;;  %v2679_v0 = vmov 0.0|0.0   ;;  %vm2680_vm0 = vmmov 0   ;;  %v2681_v1 = vmov 0.0   ;;  %vm109_vm1 = vcmask 1044480  }
  0x26   :  { %2344 = vmatprep.subr.bf16.mxu1 %v2679_v0  ;;  %2106 = vmatprep.mubr.msk.f32.mxu1 %vm2680_vm0, %v2681_v1  ;;  %vm2682_vm2 = vmmov 1   ;;  %vm84_vm4 = vcmask 105472   ;;  %v75_v2 = vld [vmem:[%s3172_s1] sm:$0xff]  ;;  %v76_v3 = vld [vmem:[%s3172_s1 + $0x8] sm:$0x1f]  ;;  %v56_v9 = vld [vmem:[#allocation2 + $0x10] sm:$0xff] }
  0x27   :  { %vm2339_vm3 = vmpackc.low %vm109_vm1, %vm2682_vm2  ;;  %v54_v4 = vld [vmem:[#allocation2] sm:$0xff]  ;;  %v2338_v5 = vpack.c.bf16 %v76_v3, %v75_v2  ;;  %v55_v6 = vld [vmem:[#allocation2 + $0x8] sm:$0xff]  ;;  %s2683_s11 = smov 32   ;;  %vm218_vm5 = vcmask 261120   ;;  %vm322_vm6 = vcmask 523264   ;;  %vm1911_vm7 = vcmask 7168  }
  0x28   :  { %v67_v7 = vld [vmem:[%s3171_s0] sm:$0xff]  ;;  %v2762_v8 = vpack.c.bf16 %v55_v6, %v54_v4  ;;  %v57_v10 = vld [vmem:[#allocation2 + $0x18] sm:$0xff]  ;;  %v68_v11 = vld [vmem:[%s3171_s0 + $0x8] sm:$0xff] }
  0x29   :  { %2086 = vmatprep.mubr.msk.f32.mxu0 %vm84_vm4, %v67_v7  ;;  %2340 = vmatprep.subr.msk.bf16.mxu0 %vm2339_vm3, %v2338_v5  ;;  %v2769_v12 = vpack.c.bf16 %v57_v10, %v56_v9  ;;  %v2782_v13 = vld [vmem:[%s3174_s3] ss:$0 sm:$0xff]  ;;  %v59_v31 = vld [vmem:[%s3175_s4 + $0x8] sm:$0xff]  ;;  %v69_v32 = vld [vmem:[%s3171_s0 + $0x10] sm:$0xff] }
  0x2a   :  { %2346 = vmatpush3.bf16.msra.mxu1 %v2762_v8  ;;  %2343 = vmatpush3.bf16.msk.msra.mxu0 %vm2339_vm3, %v2338_v5  ;;  %v58_v30 = vld [vmem:[%s3175_s4] sm:$0xff]  ;;  %v70_v34 = vld [vmem:[%s3171_s0 + $0x18] sm:$0xff]  ;;  %v60_v35 = vld [vmem:[%s3175_s4 + $0x10] sm:$0xff] }
  0x2b   :  { %2347 = vmatprep.subr.bf16.mxu1 %v2679_v0  ;;  %2350 = vmatprep.subr.bf16.mxu0 %v2679_v0  ;;  %v2801_v33 = vpack.c.bf16 %v59_v31, %v58_v30  ;;  %v61_v36 = vld [vmem:[%s3175_s4 + $0x18] sm:$0xff]  ;;  %v71_v37 = vld [vmem:[%s3171_s0 + $0x20] sm:$0xff]  ;;  %v72_v39 = vld [vmem:[%s3171_s0 + $0x28] sm:$0xff] }
  0x2c   :  { %v2818_v38 = vpack.c.bf16 %v61_v36, %v60_v35  ;;  %v62_v40 = vld [vmem:[%s3175_s4 + $0x20] sm:$0xff]  ;;  %v63_v41 = vld [vmem:[%s3175_s4 + $0x28] sm:$0xff]  ;;  %v73_v42 = vld [vmem:[%s3171_s0 + $0x30] sm:$0xff] }
  0x2d   :  { %2087 = vmatmul.mubr.msk.f32.vlgmr.msra.gmra.mrb[0].mxu0 %vm84_vm4, %v68_v11  ;;  %v2838_v43 = vpack.c.bf16 %v63_v41, %v62_v40  ;;  %v74_v44 = vld [vmem:[%s3171_s0 + $0x38] sm:$0xff]  ;;  %v64_v45 = vld [vmem:[%s3175_s4 + $0x30] sm:$0xff]  ;;  %s2684_s0 = smov 64   ;;  %v2898_v59 = vld [vmem:[%s3176_s5] sm:$0xff]  ;;  %s2685_s5 = smov 96  }
  0x2e   :  { %2349 = vmatpush3.bf16.msra.mxu1 %v2769_v12  ;;  %2089 = vmatprep.mubr.msk.f32.mxu0 %vm84_vm4, %v69_v32  ;;  %v65_v46 = vld [vmem:[%s3175_s4 + $0x38] sm:$0xff] }
  0x2f   :  { %2368 = vmatprep.subr.bf16.mxu1 %v2679_v0  ;;  %2352 = vmatpush3.bf16.msra.mxu0 %v2801_v33  ;;  %v2856_v48 = vpack.c.bf16 %v65_v46, %v64_v45 }
  0x30   :  { %2353 = vmatprep.subr.bf16.mxu0 %v2679_v0 }
  0x31   :  { %2107 = vmatmul.mubr.f32.vlgmr.msra.gmra.mrb[0].mxu1 %v2681_v1  ;;  %2090 = vmatmul.mubr.msk.f32.gmra.mrb[2].mxu0 %vm84_vm4, %v70_v34 }
  0x32   :  { %2155 = vmatprep.mubr.msk.f32.mxu1 %vm2680_vm0, %v2681_v1  ;;  %2092 = vmatprep.mubr.msk.f32.mxu0 %vm84_vm4, %v71_v37 }
  0x33   :  { %2370 = vmatpush3.bf16.msra.mxu1 %v2801_v33  ;;  %2355 = vmatpush3.bf16.msra.mxu0 %v2818_v38 }
  0x34   :  { %2371 = vmatprep.subr.bf16.mxu1 %v2679_v0  ;;  %2356 = vmatprep.subr.bf16.mxu0 %v2679_v0 }
  0x35   :  { %2093 = vmatmul.mubr.msk.f32.gmra.mrb[4].mxu0 %vm84_vm4, %v72_v39 }
  0x36   :  { %2095 = vmatprep.mubr.msk.f32.mxu0 %vm84_vm4, %v73_v42 }
  0x37   :  { %2373 = vmatpush3.bf16.msra.mxu1 %v2818_v38  ;;  %2358 = vmatpush3.bf16.msra.mxu0 %v2838_v43 }
  0x38   :  { %2374 = vmatprep.subr.bf16.mxu1 %v2679_v0  ;;  %2359 = vmatprep.subr.bf16.mxu0 %v2679_v0 }
  0x39   :  { %2096 = vmatmul.mubr.msk.f32.gmra.mrb[6].mxu0 %vm84_vm4, %v74_v44 }
  0x3a   :  { %2125 = vmatprep.mubr.msk.f32.mxu0 %vm2680_vm0, %v2681_v1 }
  0x3b   :  { %2376 = vmatpush3.bf16.msra.mxu1 %v2838_v43  ;;  %2361 = vmatpush3.bf16.msra.mxu0 %v2856_v48 }
  0x3c   :  { %2377 = vmatprep.subr.bf16.mxu1 %v2679_v0  ;;  %2362 = vmatprep.subr.bf16.mxu0 %v2679_v0 }
  0x3f   :  { %2379 = vmatpush3.bf16.msra.mxu1 %v2856_v48 }
  0x40   :  { %2398 = vmatprep.subr.bf16.mxu1 %v2679_v0 }
 0x100   :  { %v2784_v14 = vpop.f32.mrb[0].mxu0 }
 0x101   :  { %v179_v15 = vpop.f32.mrb[1].mxu0  ;;  %v185_v63 = vadd.f32 %v2784_v14, %v2782_v13 }
 0x102   :  { %v180_v16 = vadd.f32 %v2782_v13, %v179_v15 }
 0x104   :  { %v288_v17 = vpop.f32.mrb[0].mxu1  ;;  %v2868_v51 = vpop.f32.mrb[2].mxu0 }
 0x105   :  { %v292_v18 = vadd.f32 %v288_v17, %v180_v16  ;;  %v2108_v19 = vpop.f32.mrb[1].mxu1  ;;  %v2870_v52 = vpop.f32.mrb[3].mxu0 }
 0x106   :  { %v190_v39 = vadd.f32 %v2782_v13, %v2870_v52 }
 0x107   :  { %2499 = vtanh.f32 %v292_v18  ;;  %v1929_v21 = vmul.f32 -1.442695, %v292_v18 }
 0x108   :  { %v2872_v53 = vpop.f32.mrb[4].mxu0 }
 0x109   :  { %2501 = vpow2.f32 %v1929_v21  ;;  %v2874_v54 = vpop.f32.mrb[5].mxu0 }
 0x10c   :  { %v2876_v55 = vpop.f32.mrb[6].mxu0 }
 0x10d   :  { %v2878_v56 = vpop.f32.mrb[7].mxu0 }
 0x111   :  { %v2500_v20 = vpop.eup %2499 }
 0x112   :  { %302 = vrot.lane.b32.xlu0 %v2500_v20, %s2683_s11 }
 0x113   :  { %v2502_v22 = vpop.eup %2501 }
 0x114   :  { %v296_v23 = vadd.f32 1.0, %v2502_v22 }
 0x116   :  { %2503 = vrcp.f32 %v296_v23 }
 0x120   :  { %v2504_v24 = vpop.eup %2503 }
 0x121   :  { %v300_v27 = vmul.f32 0.0, %v2504_v24 }
 0x184   :  { %v303_v25 = vpop.permute.xlu0 %302 }
 0x185   :  { %v305_v26 = vmul.f32 %v2504_v24, %v303_v25 }
 0x187   :  { %307 = vrot.lane.b32.xlu0 %v305_v26, %s2683_s11 }
 0x1f9   :  { %v308_v28 = vpop.permute.xlu0 %307 }
 0x1fa   :  { %v2789_v29 = vadd.f32 %v308_v28, %v300_v27 }
 0x1fc   :  { %2505 = vtanh.f32 %v2789_v29 }
 0x206   :  { %v2506_v47 = vpop.eup %2505 }
 0x207   :  { %313 = vrot.lane.b32.xlu1 %v2506_v47, %s2683_s11 }
 0x279   :  { %v314_v49 = vpop.permute.xlu1 %313 }
 0x27a   :  { %v316_v50 = vmul.f32 %v2504_v24, %v314_v49 }
 0x27c   :  { %318 = vrot.lane.b32.xlu1 %v316_v50, %s2684_s0 }
 0x2ee   :  { %v319_v57 = vpop.permute.xlu1 %318 }
 0x2ef   :  { %v321_v58 = vsel %vm218_vm5, %v319_v57, 0.0 }
 0x2f0   :  { %2126 = vmatmul.mubr.msk.f32.vlgmr.msra.gmra.mrb[8].mxu0 %vm322_vm6, %v321_v58 }
 0x2f1   :  { %2364 = vmatpush3.bf16.msra.mxu0 %v2762_v8  ;;  %2136 = vmatprep.mubr.msk.f32.mxu0 %vm2680_vm0, %v2681_v1 }
 0x2f2   :  { %2365 = vmatprep.subr.bf16.mxu0 %v2679_v0 }
 0x2f5   :  { %2367 = vmatpush3.bf16.msra.mxu0 %v2769_v12 }
 0x2f6   :  { %2380 = vmatprep.subr.bf16.mxu0 %v2679_v0 }
 0x2f8   :  { %2137 = vmatmul.mubr.msk.f32.vlgmr.msra.gmra.mrb[10].mxu0 %vm218_vm5, %v319_v57 }
 0x2f9   :  { %2382 = vmatpush3.bf16.msra.mxu0 %v2762_v8  ;;  %2166 = vmatprep.mubr.msk.f32.mxu0 %vm2680_vm0, %v2681_v1 }
 0x2fa   :  { %2383 = vmatprep.subr.bf16.mxu0 %v2679_v0 }
 0x2fd   :  { %2385 = vmatpush3.bf16.msra.mxu0 %v2769_v12 }
 0x2fe   :  { %2386 = vmatprep.subr.bf16.mxu0 %v2679_v0 }
 0x3c3   :  { %v392_v60 = vpop.f32.mrb[8].mxu0 }
 0x3c4   :  { %v393_v61 = vadd.f32 %v392_v60, %v2898_v59  ;;  %v2127_v62 = vpop.f32.mrb[9].mxu0 }
 0x3c6   :  { %2507 = vtanh.f32 %v393_v61  ;;  %v1931_v7 = vmul.f32 -1.442695, %v393_v61 }
 0x3cb   :  { %v495_v2 = vpop.f32.mrb[10].mxu0 }
 0x3cc   :  { %v499_v3 = vadd.f32 %v495_v2, %v185_v63  ;;  %v2138_v4 = vpop.f32.mrb[11].mxu0 }
 0x3ce   :  { %2509 = vtanh.f32 %v499_v3  ;;  %v1933_v9 = vmul.f32 -1.442695, %v499_v3 }
 0x3cf   :  { %2511 = vpow2.f32 %v1931_v7 }
 0x3d0   :  { %v2508_v5 = vpop.eup %2507  ;;  %2513 = vpow2.f32 %v1933_v9 }
 0x3d1   :  { %405 = vrot.lane.b32.xlu0 %v2508_v5, %s2683_s11 }
 0x3d8   :  { %v2510_v6 = vpop.eup %2509 }
 0x3d9   :  { %509 = vrot.lane.b32.xlu1 %v2510_v6, %s2683_s11  ;;  %v2512_v10 = vpop.eup %2511 }
 0x3da   :  { %v399_v11 = vadd.f32 1.0, %v2512_v10  ;;  %v2514_v15 = vpop.eup %2513 }
 0x3db   :  { %v503_v16 = vadd.f32 1.0, %v2514_v15 }
 0x3dc   :  { %2515 = vrcp.f32 %v399_v11 }
 0x3dd   :  { %2517 = vrcp.f32 %v503_v16 }
 0x3e6   :  { %v2516_v14 = vpop.eup %2515 }
 0x3e7   :  { %v2518_v19 = vpop.eup %2517  ;;  %v403_v22 = vmul.f32 0.0, %v2516_v14 }
 0x3e8   :  { %v507_v25 = vmul.f32 %v2518_v19, %v2789_v29 }
 0x443   :  { %v406_v17 = vpop.permute.xlu0 %405 }
 0x444   :  { %v408_v18 = vmul.f32 %v2516_v14, %v406_v17 }
 0x446   :  { %410 = vrot.lane.b32.xlu0 %v408_v18, %s2683_s11 }
 0x44b   :  { %v510_v20 = vpop.permute.xlu1 %509 }
 0x44c   :  { %v512_v21 = vmul.f32 %v2518_v19, %v510_v20 }
 0x44e   :  { %514 = vrot.lane.b32.xlu1 %v512_v21, %s2683_s11 }
 0x4b8   :  { %v411_v23 = vpop.permute.xlu0 %410 }
 0x4b9   :  { %v2907_v24 = vadd.f32 %v411_v23, %v403_v22 }
 0x4bb   :  { %2519 = vtanh.f32 %v2907_v24 }
 0x4c0   :  { %v515_v26 = vpop.permute.xlu1 %514 }
 0x4c1   :  { %v2911_v27 = vadd.f32 %v515_v26, %v507_v25 }
 0x4c3   :  { %2521 = vtanh.f32 %v2911_v27 }
 0x4c5   :  { %v2520_v28 = vpop.eup %2519 }
 0x4c6   :  { %416 = vrot.lane.b32.xlu0 %v2520_v28, %s2683_s11 }
 0x4cd   :  { %v2522_v30 = vpop.eup %2521 }
 0x4ce   :  { %520 = vrot.lane.b32.xlu1 %v2522_v30, %s2683_s11 }
 0x538   :  { %v417_v31 = vpop.permute.xlu0 %416 }
 0x539   :  { %v2916_v32 = vmul.f32 %v2516_v14, %v417_v31 }
 0x53b   :  { %529 = vrot.lane.b32.xlu1 %v2916_v32, %s2685_s5 }
 0x540   :  { %v521_v34 = vpop.permute.xlu1 %520 }
 0x541   :  { %v523_v29 = vmul.f32 %v2518_v19, %v521_v34 }
 0x543   :  { %525 = vrot.lane.b32.xlu0 %v523_v29, %s2684_s0 }
 0x5ad   :  { %v530_v35 = vpop.permute.xlu1 %529 }
 0x5b5   :  { %v526_v36 = vpop.permute.xlu0 %525 }
 0x5b6   :  { %v532_v37 = vsel %vm218_vm5, %v526_v36, %v530_v35  ;;  %2167 = vmatmul.mubr.msk.f32.vlgmr.msra.gmra.mrb[12].mxu0 %vm218_vm5, %v526_v36 }
 0x5b7   :  { %2156 = vmatmul.mubr.msk.f32.vlgmr.msra.gmra.mrb[2].mxu1 %vm322_vm6, %v532_v37  ;;  %2388 = vmatpush3.bf16.msra.mxu0 %v2801_v33 }
 0x5b8   :  { %2389 = vmatprep.subr.bf16.mxu0 %v2679_v0  ;;  %2400 = vmatpush3.bf16.msra.mxu1 %v2762_v8 }
 0x5b9   :  { %2401 = vmatprep.subr.bf16.mxu1 %v2679_v0  ;;  %2196 = vmatprep.mubr.msk.f32.mxu1 %vm2680_vm0, %v2681_v1 }
 0x5ba   :  { %2185 = vmatprep.mubr.msk.f32.mxu0 %vm2680_vm0, %v2681_v1 }
 0x5bb   :  { %2391 = vmatpush3.bf16.msra.mxu0 %v2818_v38 }
 0x5bc   :  { %2392 = vmatprep.subr.bf16.mxu0 %v2679_v0  ;;  %2403 = vmatpush3.bf16.msra.mxu1 %v2769_v12 }
 0x5bd   :  { %2404 = vmatprep.subr.bf16.mxu1 %v2679_v0 }
 0x5bf   :  { %2394 = vmatpush3.bf16.msra.mxu0 %v2838_v43 }
 0x5c0   :  { %2395 = vmatprep.subr.bf16.mxu0 %v2679_v0 }
 0x5c3   :  { %2397 = vmatpush3.bf16.msra.mxu0 %v2856_v48 }
 0x5c4   :  { %2416 = vmatprep.subr.bf16.mxu0 %v2679_v0 }
 0x689   :  { %v706_v40 = vpop.f32.mrb[12].mxu0 }
 0x68a   :  { %v710_v41 = vadd.f32 %v706_v40, %v190_v39  ;;  %v602_v42 = vpop.f32.mrb[2].mxu1  ;;  %v2168_v44 = vpop.f32.mrb[13].mxu0 }
 0x68b   :  { %v603_v45 = vadd.f32 %v602_v42, %v2898_v59  ;;  %v2157_v46 = vpop.f32.mrb[3].mxu1 }
 0x68c   :  { %2523 = vtanh.f32 %v710_v41  ;;  %v1937_v50 = vmul.f32 -1.442695, %v710_v41 }
 0x68d   :  { %2525 = vtanh.f32 %v603_v45  ;;  %v1935_v57 = vmul.f32 -1.442695, %v603_v45 }
 0x68e   :  { %2527 = vpow2.f32 %v1937_v50 }
 0x68f   :  { %2529 = vpow2.f32 %v1935_v57 }
 0x696   :  { %v2524_v47 = vpop.eup %2523 }
 0x697   :  { %v2526_v49 = vpop.eup %2525  ;;  %720 = vrot.lane.b32.xlu1 %v2524_v47, %s2683_s11 }
 0x698   :  { %615 = vrot.lane.b32.xlu0 %v2526_v49, %s2683_s11  ;;  %v2528_v52 = vpop.eup %2527 }
 0x699   :  { %v2530_v58 = vpop.eup %2529  ;;  %v714_v60 = vadd.f32 1.0, %v2528_v52 }
 0x69a   :  { %v609_v61 = vadd.f32 1.0, %v2530_v58 }
 0x69b   :  { %2531 = vrcp.f32 %v714_v60 }
 0x69c   :  { %2533 = vrcp.f32 %v609_v61 }
 0x6a5   :  { %v2532_v62 = vpop.eup %2531 }
 0x6a6   :  { %v2534_v2 = vpop.eup %2533  ;;  %v718_v6 = vmul.f32 %v2532_v62, %v2911_v27 }
 0x6a7   :  { %v613_v9 = vmul.f32 %v2534_v2, %v2907_v24  ;;  %v195_v24 = vadd.f32 %v2868_v51, %v2782_v13 }
 0x709   :  { %v721_v63 = vpop.permute.xlu1 %720 }
 0x70a   :  { %v723_v3 = vmul.f32 %v2532_v62, %v721_v63  ;;  %v616_v4 = vpop.permute.xlu0 %615 }
 0x70b   :  { %v618_v5 = vmul.f32 %v2534_v2, %v616_v4 }
 0x70c   :  { %725 = vrot.lane.b32.xlu1 %v723_v3, %s2683_s11 }
 0x70d   :  { %620 = vrot.lane.b32.xlu0 %v618_v5, %s2683_s11 }
 0x77e   :  { %v726_v7 = vpop.permute.xlu1 %725 }
 0x77f   :  { %v2949_v10 = vadd.f32 %v726_v7, %v718_v6  ;;  %v621_v11 = vpop.permute.xlu0 %620 }
 0x780   :  { %v2951_v15 = vadd.f32 %v621_v11, %v613_v9  ;;  %v200_v9 = vadd.f32 %v2782_v13, %v2874_v54 }
 0x781   :  { %2535 = vtanh.f32 %v2949_v10 }
 0x782   :  { %2537 = vtanh.f32 %v2951_v15 }
 0x78b   :  { %v2536_v16 = vpop.eup %2535 }
 0x78c   :  { %v2538_v14 = vpop.eup %2537  ;;  %731 = vrot.lane.b32.xlu1 %v2536_v16, %s2683_s11 }
 0x78d   :  { %626 = vrot.lane.b32.xlu0 %v2538_v14, %s2683_s11 }
 0x7fe   :  { %v732_v17 = vpop.permute.xlu1 %731 }
 0x7ff   :  { %v734_v18 = vmul.f32 %v2532_v62, %v732_v17  ;;  %v627_v19 = vpop.permute.xlu0 %626 }
 0x800   :  { %v2957_v20 = vmul.f32 %v2534_v2, %v627_v19 }
 0x801   :  { %736 = vrot.lane.b32.xlu0 %v734_v18, %s2684_s0 }
 0x802   :  { %740 = vrot.lane.b32.xlu1 %v2957_v20, %s2685_s5 }
 0x873   :  { %v737_v21 = vpop.permute.xlu0 %736 }
 0x874   :  { %v741_v22 = vpop.permute.xlu1 %740  ;;  %2197 = vmatmul.mubr.msk.f32.vlgmr.msra.gmra.mrb[4].mxu1 %vm218_vm5, %v737_v21 }
 0x875   :  { %v743_v23 = vsel %vm218_vm5, %v737_v21, %v741_v22  ;;  %2406 = vmatpush3.bf16.msra.mxu1 %v2801_v33  ;;  %2215 = vmatprep.mubr.msk.f32.mxu1 %vm2680_vm0, %v2681_v1 }
 0x876   :  { %2186 = vmatmul.mubr.msk.f32.vlgmr.msra.gmra.mrb[14].mxu0 %vm322_vm6, %v743_v23  ;;  %2407 = vmatprep.subr.bf16.mxu1 %v2679_v0 }
 0x877   :  { %2418 = vmatpush3.bf16.msra.mxu0 %v2762_v8  ;;  %2226 = vmatprep.mubr.msk.f32.mxu0 %vm2680_vm0, %v2681_v1 }
 0x878   :  { %2419 = vmatprep.subr.bf16.mxu0 %v2679_v0 }
 0x879   :  { %2409 = vmatpush3.bf16.msra.mxu1 %v2818_v38 }
 0x87a   :  { %2410 = vmatprep.subr.bf16.mxu1 %v2679_v0 }
 0x87b   :  { %2421 = vmatpush3.bf16.msra.mxu0 %v2769_v12 }
 0x87c   :  { %2422 = vmatprep.subr.bf16.mxu0 %v2679_v0 }
 0x87d   :  { %2412 = vmatpush3.bf16.msra.mxu1 %v2838_v43 }
 0x87e   :  { %2413 = vmatprep.subr.bf16.mxu1 %v2679_v0 }
 0x881   :  { %2415 = vmatpush3.bf16.msra.mxu1 %v2856_v48 }
 0x882   :  { %2434 = vmatprep.subr.bf16.mxu1 %v2679_v0 }
 0x947   :  { %v917_v25 = vpop.f32.mrb[4].mxu1 }
 0x948   :  { %v921_v26 = vadd.f32 %v917_v25, %v195_v24  ;;  %v2198_v27 = vpop.f32.mrb[5].mxu1 }
 0x949   :  { %v813_v28 = vpop.f32.mrb[14].mxu0 }
 0x94a   :  { %2539 = vtanh.f32 %v921_v26  ;;  %v814_v30 = vadd.f32 %v813_v28, %v2898_v59  ;;  %v2187_v31 = vpop.f32.mrb[15].mxu0  ;;  %v1941_v35 = vmul.f32 -1.442695, %v921_v26 }
 0x94c   :  { %2541 = vtanh.f32 %v814_v30  ;;  %v1939_v36 = vmul.f32 -1.442695, %v814_v30 }
 0x94d   :  { %2543 = vpow2.f32 %v1941_v35 }
 0x94e   :  { %2545 = vpow2.f32 %v1939_v36 }
 0x954   :  { %v2540_v34 = vpop.eup %2539 }
 0x955   :  { %931 = vrot.lane.b32.xlu1 %v2540_v34, %s2683_s11 }
 0x956   :  { %v2542_v29 = vpop.eup %2541 }
 0x957   :  { %826 = vrot.lane.b32.xlu0 %v2542_v29, %s2683_s11  ;;  %v2544_v51 = vpop.eup %2543 }
 0x958   :  { %v2546_v37 = vpop.eup %2545  ;;  %v925_v39 = vadd.f32 1.0, %v2544_v51 }
 0x959   :  { %v820_v40 = vadd.f32 1.0, %v2546_v37 }
 0x95a   :  { %2547 = vrcp.f32 %v925_v39 }
 0x95b   :  { %2549 = vrcp.f32 %v820_v40 }
 0x964   :  { %v2548_v41 = vpop.eup %2547 }
 0x965   :  { %v2550_v45 = vpop.eup %2549  ;;  %v929_v49 = vmul.f32 %v2548_v41, %v2949_v10 }
 0x966   :  { %v824_v52 = vmul.f32 %v2550_v45, %v2951_v15 }
 0x9c7   :  { %v932_v42 = vpop.permute.xlu1 %931 }
 0x9c8   :  { %v934_v44 = vmul.f32 %v2548_v41, %v932_v42 }
 0x9c9   :  { %v827_v46 = vpop.permute.xlu0 %826 }
 0x9ca   :  { %936 = vrot.lane.b32.xlu1 %v934_v44, %s2683_s11  ;;  %v829_v47 = vmul.f32 %v2550_v45, %v827_v46 }
 0x9cc   :  { %831 = vrot.lane.b32.xlu0 %v829_v47, %s2683_s11 }
 0xa3c   :  { %v937_v50 = vpop.permute.xlu1 %936 }
 0xa3d   :  { %v2989_v57 = vadd.f32 %v937_v50, %v929_v49 }
 0xa3e   :  { %v832_v58 = vpop.permute.xlu0 %831 }
 0xa3f   :  { %2551 = vtanh.f32 %v2989_v57  ;;  %v2993_v60 = vadd.f32 %v832_v58, %v824_v52 }
 0xa41   :  { %2553 = vtanh.f32 %v2993_v60 }
 0xa49   :  { %v2552_v61 = vpop.eup %2551 }
 0xa4a   :  { %942 = vrot.lane.b32.xlu1 %v2552_v61, %s2683_s11 }
 0xa4b   :  { %v2554_v62 = vpop.eup %2553 }
 0xa4c   :  { %837 = vrot.lane.b32.xlu0 %v2554_v62, %s2683_s11 }
 0xabc   :  { %v943_v63 = vpop.permute.xlu1 %942 }
 0xabd   :  { %v945_v2 = vmul.f32 %v2548_v41, %v943_v63 }
 0xabe   :  { %v838_v3 = vpop.permute.xlu0 %837 }
 0xabf   :  { %947 = vrot.lane.b32.xlu0 %v945_v2, %s2684_s0  ;;  %v2999_v4 = vmul.f32 %v2550_v45, %v838_v3 }
 0xac1   :  { %951 = vrot.lane.b32.xlu1 %v2999_v4, %s2685_s5 }
 0xb31   :  { %v948_v5 = vpop.permute.xlu0 %947 }
 0xb32   :  { %2227 = vmatmul.mubr.msk.f32.vlgmr.msra.gmra.mrb[16].mxu0 %vm218_vm5, %v948_v5 }
 0xb33   :  { %2424 = vmatpush3.bf16.msra.mxu0 %v2801_v33  ;;  %2245 = vmatprep.mubr.msk.f32.mxu0 %vm2680_vm0, %v2681_v1  ;;  %v952_v6 = vpop.permute.xlu1 %951 }
 0xb34   :  { %2425 = vmatprep.subr.bf16.mxu0 %v2679_v0  ;;  %v954_v7 = vsel %vm218_vm5, %v948_v5, %v952_v6 }
 0xb35   :  { %2216 = vmatmul.mubr.msk.f32.vlgmr.msra.gmra.mrb[6].mxu1 %vm322_vm6, %v954_v7 }
 0xb36   :  { %2436 = vmatpush3.bf16.msra.mxu1 %v2762_v8  ;;  %2256 = vmatprep.mubr.msk.f32.mxu1 %vm2680_vm0, %v2681_v1 }
 0xb37   :  { %2427 = vmatpush3.bf16.msra.mxu0 %v2818_v38  ;;  %2437 = vmatprep.subr.bf16.mxu1 %v2679_v0 }
 0xb38   :  { %2428 = vmatprep.subr.bf16.mxu0 %v2679_v0 }
 0xb3a   :  { %2439 = vmatpush3.bf16.msra.mxu1 %v2769_v12 }
 0xb3b   :  { %2430 = vmatpush3.bf16.msra.mxu0 %v2838_v43  ;;  %2440 = vmatprep.subr.bf16.mxu1 %v2679_v0 }
 0xb3c   :  { %2431 = vmatprep.subr.bf16.mxu0 %v2679_v0 }
 0xb3f   :  { %2433 = vmatpush3.bf16.msra.mxu0 %v2856_v48 }
 0xb40   :  { %2452 = vmatprep.subr.bf16.mxu0 %v2679_v0 }
 0xc05   :  { %v1128_v10 = vpop.f32.mrb[16].mxu0 }
 0xc06   :  { %v1132_v11 = vadd.f32 %v1128_v10, %v200_v9  ;;  %v2228_v15 = vpop.f32.mrb[17].mxu0 }
 0xc08   :  { %2555 = vtanh.f32 %v1132_v11  ;;  %v1024_v16 = vpop.f32.mrb[6].mxu1  ;;  %v1945_v21 = vmul.f32 -1.442695, %v1132_v11 }
 0xc09   :  { %v1025_v14 = vadd.f32 %v1024_v16, %v2898_v59  ;;  %v2217_v17 = vpop.f32.mrb[7].mxu1 }
 0xc0b   :  { %2557 = vtanh.f32 %v1025_v14  ;;  %v1943_v22 = vmul.f32 -1.442695, %v1025_v14 }
 0xc0c   :  { %2559 = vpow2.f32 %v1945_v21 }
 0xc0d   :  { %2561 = vpow2.f32 %v1943_v22 }
 0xc12   :  { %v2556_v18 = vpop.eup %2555 }
 0xc13   :  { %1142 = vrot.lane.b32.xlu1 %v2556_v18, %s2683_s11 }
 0xc15   :  { %v2558_v19 = vpop.eup %2557 }
 0xc16   :  { %1037 = vrot.lane.b32.xlu0 %v2558_v19, %s2683_s11  ;;  %v2560_v54 = vpop.eup %2559 }
 0xc17   :  { %v1136_v23 = vadd.f32 1.0, %v2560_v54  ;;  %v2562_v24 = vpop.eup %2561 }
 0xc18   :  { %v1031_v25 = vadd.f32 1.0, %v2562_v24 }
 0xc19   :  { %2563 = vrcp.f32 %v1136_v23 }
 0xc1a   :  { %2565 = vrcp.f32 %v1031_v25 }
 0xc23   :  { %v2564_v26 = vpop.eup %2563 }
 0xc24   :  { %v2566_v30 = vpop.eup %2565  ;;  %v1140_v29 = vmul.f32 %v2564_v26, %v2989_v57  ;;  %v205_v57 = vadd.f32 %v2872_v53, %v2782_v13 }
 0xc25   :  { %v1035_v51 = vmul.f32 %v2566_v30, %v2993_v60 }
 0xc85   :  { %v1143_v27 = vpop.permute.xlu1 %1142 }
 0xc86   :  { %v1145_v28 = vmul.f32 %v2564_v26, %v1143_v27 }
 0xc88   :  { %1147 = vrot.lane.b32.xlu1 %v1145_v28, %s2683_s11  ;;  %v1038_v31 = vpop.permute.xlu0 %1037 }
 0xc89   :  { %v1040_v34 = vmul.f32 %v2566_v30, %v1038_v31 }
 0xc8b   :  { %1042 = vrot.lane.b32.xlu0 %v1040_v34, %s2683_s11 }
 0xcfa   :  { %v1148_v35 = vpop.permute.xlu1 %1147 }
 0xcfb   :  { %v3030_v36 = vadd.f32 %v1148_v35, %v1140_v29 }
 0xcfd   :  { %2567 = vtanh.f32 %v3030_v36  ;;  %v1043_v37 = vpop.permute.xlu0 %1042 }
 0xcfe   :  { %v3034_v39 = vadd.f32 %v1043_v37, %v1035_v51 }
 0xd00   :  { %2569 = vtanh.f32 %v3034_v39 }
 0xd07   :  { %v2568_v40 = vpop.eup %2567 }
 0xd08   :  { %1153 = vrot.lane.b32.xlu1 %v2568_v40, %s2683_s11 }
 0xd0a   :  { %v2570_v41 = vpop.eup %2569 }
 0xd0b   :  { %1048 = vrot.lane.b32.xlu0 %v2570_v41, %s2683_s11 }
 0xd7a   :  { %v1154_v42 = vpop.permute.xlu1 %1153 }
 0xd7b   :  { %v1156_v44 = vmul.f32 %v2564_v26, %v1154_v42 }
 0xd7d   :  { %1158 = vrot.lane.b32.xlu0 %v1156_v44, %s2684_s0  ;;  %v1049_v45 = vpop.permute.xlu0 %1048 }
 0xd7e   :  { %v3040_v46 = vmul.f32 %v2566_v30, %v1049_v45 }
 0xd80   :  { %1162 = vrot.lane.b32.xlu1 %v3040_v46, %s2685_s5 }
 0xdef   :  { %v1159_v47 = vpop.permute.xlu0 %1158 }
 0xdf0   :  { %2257 = vmatmul.mubr.msk.f32.vlgmr.msra.gmra.mrb[8].mxu1 %vm218_vm5, %v1159_v47 }
 0xdf1   :  { %2442 = vmatpush3.bf16.msra.mxu1 %v2801_v33  ;;  %2275 = vmatprep.mubr.msk.f32.mxu1 %vm2680_vm0, %v2681_v1 }
 0xdf2   :  { %2443 = vmatprep.subr.bf16.mxu1 %v2679_v0  ;;  %v1163_v49 = vpop.permute.xlu1 %1162 }
 0xdf3   :  { %v1165_v50 = vsel %vm218_vm5, %v1159_v47, %v1163_v49 }
 0xdf4   :  { %2246 = vmatmul.mubr.msk.f32.vlgmr.msra.gmra.mrb[18].mxu0 %vm322_vm6, %v1165_v50 }
 0xdf5   :  { %2445 = vmatpush3.bf16.msra.mxu1 %v2818_v38  ;;  %2454 = vmatpush3.bf16.msra.mxu0 %v2762_v8 }
 0xdf6   :  { %2446 = vmatprep.subr.bf16.mxu1 %v2679_v0  ;;  %2455 = vmatprep.subr.bf16.mxu0 %v2679_v0 }
 0xdf7   :  { %2286 = vmatprep.mubr.msk.f32.mxu0 %vm2680_vm0, %v2681_v1 }
 0xdf9   :  { %2448 = vmatpush3.bf16.msra.mxu1 %v2838_v43  ;;  %2457 = vmatpush3.bf16.msra.mxu0 %v2769_v12 }
 0xdfa   :  { %2449 = vmatprep.subr.bf16.mxu1 %v2679_v0  ;;  %2458 = vmatprep.subr.bf16.mxu0 %v2679_v0 }
 0xdfd   :  { %2451 = vmatpush3.bf16.msra.mxu1 %v2856_v48 }
 0xdfe   :  { %2470 = vmatprep.subr.bf16.mxu1 %v2679_v0 }
 0xec3   :  { %v1339_v52 = vpop.f32.mrb[8].mxu1 }
 0xec4   :  { %v1343_v58 = vadd.f32 %v1339_v52, %v205_v57  ;;  %v2258_v60 = vpop.f32.mrb[9].mxu1 }
 0xec6   :  { %2571 = vtanh.f32 %v1343_v58  ;;  %v1949_v5 = vmul.f32 -1.442695, %v1343_v58 }
 0xec7   :  { %v1235_v61 = vpop.f32.mrb[18].mxu0 }
 0xec8   :  { %v1236_v62 = vadd.f32 %v1235_v61, %v2898_v59  ;;  %v2247_v63 = vpop.f32.mrb[19].mxu0 }
 0xeca   :  { %2573 = vtanh.f32 %v1236_v62  ;;  %v1947_v6 = vmul.f32 -1.442695, %v1236_v62 }
 0xecb   :  { %2575 = vpow2.f32 %v1949_v5 }
 0xecc   :  { %2577 = vpow2.f32 %v1947_v6 }
 0xed0   :  { %v2572_v2 = vpop.eup %2571 }
 0xed1   :  { %1353 = vrot.lane.b32.xlu1 %v2572_v2, %s2683_s11 }
 0xed4   :  { %v2574_v3 = vpop.eup %2573 }
 0xed5   :  { %1248 = vrot.lane.b32.xlu0 %v2574_v3, %s2683_s11  ;;  %v2576_v53 = vpop.eup %2575 }
 0xed6   :  { %v1347_v7 = vadd.f32 1.0, %v2576_v53  ;;  %v2578_v9 = vpop.eup %2577 }
 0xed7   :  { %v1242_v10 = vadd.f32 1.0, %v2578_v9 }
 0xed8   :  { %2579 = vrcp.f32 %v1347_v7 }
 0xed9   :  { %2581 = vrcp.f32 %v1242_v10 }
 0xee2   :  { %v2580_v11 = vpop.eup %2579 }
 0xee3   :  { %v2582_v14 = vpop.eup %2581  ;;  %v1351_v19 = vmul.f32 %v2580_v11, %v3030_v36  ;;  %v210_v36 = vadd.f32 %v2782_v13, %v2878_v56 }
 0xee4   :  { %v1246_v54 = vmul.f32 %v2582_v14, %v3034_v39 }
 0xf43   :  { %v1354_v15 = vpop.permute.xlu1 %1353 }
 0xf44   :  { %v1356_v16 = vmul.f32 %v2580_v11, %v1354_v15 }
 0xf46   :  { %1358 = vrot.lane.b32.xlu1 %v1356_v16, %s2683_s11 }
 0xf47   :  { %v1249_v17 = vpop.permute.xlu0 %1248 }
 0xf48   :  { %v1251_v18 = vmul.f32 %v2582_v14, %v1249_v17 }
 0xf4a   :  { %1253 = vrot.lane.b32.xlu0 %v1251_v18, %s2683_s11 }
 0xfb8   :  { %v1359_v21 = vpop.permute.xlu1 %1358 }
 0xfb9   :  { %v3071_v22 = vadd.f32 %v1359_v21, %v1351_v19 }
 0xfbb   :  { %2583 = vtanh.f32 %v3071_v22 }
 0xfbc   :  { %v1254_v23 = vpop.permute.xlu0 %1253 }
 0xfbd   :  { %v3075_v24 = vadd.f32 %v1254_v23, %v1246_v54 }
 0xfbf   :  { %2585 = vtanh.f32 %v3075_v24 }
 0xfc5   :  { %v2584_v25 = vpop.eup %2583 }
 0xfc6   :  { %1364 = vrot.lane.b32.xlu1 %v2584_v25, %s2683_s11 }
 0xfc9   :  { %v2586_v26 = vpop.eup %2585 }
 0xfca   :  { %1259 = vrot.lane.b32.xlu0 %v2586_v26, %s2683_s11 }
0x1038   :  { %v1365_v27 = vpop.permute.xlu1 %1364 }
0x1039   :  { %v1367_v28 = vmul.f32 %v2580_v11, %v1365_v27 }
0x103b   :  { %1369 = vrot.lane.b32.xlu0 %v1367_v28, %s2684_s0 }
0x103c   :  { %v1260_v30 = vpop.permute.xlu0 %1259 }
0x103d   :  { %v3081_v31 = vmul.f32 %v2582_v14, %v1260_v30 }
0x103f   :  { %1373 = vrot.lane.b32.xlu1 %v3081_v31, %s2685_s5 }
0x10ad   :  { %v1370_v34 = vpop.permute.xlu0 %1369 }
0x10ae   :  { %2287 = vmatmul.mubr.msk.f32.vlgmr.msra.gmra.mrb[20].mxu0 %vm218_vm5, %v1370_v34 }
0x10af   :  { %2460 = vmatpush3.bf16.msra.mxu0 %v2801_v33  ;;  %2305 = vmatprep.mubr.msk.f32.mxu0 %vm2680_vm0, %v2681_v1 }
0x10b0   :  { %2461 = vmatprep.subr.bf16.mxu0 %v2679_v0 }
0x10b1   :  { %v1374_v29 = vpop.permute.xlu1 %1373 }
0x10b2   :  { %v1376_v35 = vsel %vm218_vm5, %v1370_v34, %v1374_v29 }
0x10b3   :  { %2463 = vmatpush3.bf16.msra.mxu0 %v2818_v38  ;;  %2276 = vmatmul.mubr.msk.f32.vlgmr.msra.gmra.mrb[10].mxu1 %vm322_vm6, %v1376_v35 }
0x10b4   :  { %2464 = vmatprep.subr.bf16.mxu0 %v2679_v0  ;;  %2472 = vmatpush3.bf16.msra.mxu1 %v2762_v8 }
0x10b5   :  { %2316 = vmatprep.mubr.msk.f32.mxu1 %vm2680_vm0, %v2681_v1  ;;  %2473 = vmatprep.subr.bf16.mxu1 %v2679_v0 }
0x10b7   :  { %2466 = vmatpush3.bf16.msra.mxu0 %v2838_v43 }
0x10b8   :  { %2467 = vmatprep.subr.bf16.mxu0 %v2679_v0  ;;  %2475 = vmatpush3.bf16.msra.mxu1 %v2769_v12 }
0x10b9   :  { %2476 = vmatprep.subr.bf16.mxu1 %v2679_v0 }
0x10bb   :  { %2469 = vmatpush3.bf16.msra.mxu0 %v2856_v48 }
0x1181   :  { %v1550_v51 = vpop.f32.mrb[20].mxu0 }
0x1182   :  { %v1554_v8 = vadd.f32 %v1550_v51, %v210_v36  ;;  %v2288_v37 = vpop.f32.mrb[21].mxu0 }
0x1184   :  { %2587 = vtanh.f32 %v1554_v8  ;;  %v1953_v44 = vmul.f32 -1.442695, %v1554_v8 }
0x1186   :  { %v1446_v39 = vpop.f32.mrb[10].mxu1 }
0x1187   :  { %v1447_v40 = vadd.f32 %v1446_v39, %v2898_v59  ;;  %v2277_v41 = vpop.f32.mrb[11].mxu1 }
0x1189   :  { %2589 = vtanh.f32 %v1447_v40  ;;  %v1951_v45 = vmul.f32 -1.442695, %v1447_v40 }
0x118a   :  { %2591 = vpow2.f32 %v1953_v44 }
0x118b   :  { %2593 = vpow2.f32 %v1951_v45 }
0x118e   :  { %v2588_v42 = vpop.eup %2587 }
0x118f   :  { %1564 = vrot.lane.b32.xlu1 %v2588_v42, %s2683_s11 }
0x1193   :  { %v2590_v12 = vpop.eup %2589 }
0x1194   :  { %1459 = vrot.lane.b32.xlu0 %v2590_v12, %s2683_s11  ;;  %v2592_v56 = vpop.eup %2591 }
0x1195   :  { %v1558_v47 = vadd.f32 1.0, %v2592_v56  ;;  %v2594_v49 = vpop.eup %2593 }
0x1196   :  { %v1453_v50 = vadd.f32 1.0, %v2594_v49 }
0x1197   :  { %2595 = vrcp.f32 %v1558_v47 }
0x1198   :  { %2597 = vrcp.f32 %v1453_v50 }
0x11a1   :  { %v2596_v57 = vpop.eup %2595 }
0x11a2   :  { %v2598_v60 = vpop.eup %2597  ;;  %v1562_v63 = vmul.f32 %v2596_v57, %v3071_v22 }
0x11a3   :  { %v1457_v5 = vmul.f32 %v2598_v60, %v3075_v24 }
0x1201   :  { %v1565_v52 = vpop.permute.xlu1 %1564 }
0x1202   :  { %v1567_v58 = vmul.f32 %v2596_v57, %v1565_v52 }
0x1204   :  { %1569 = vrot.lane.b32.xlu1 %v1567_v58, %s2683_s11 }
0x1206   :  { %v1460_v61 = vpop.permute.xlu0 %1459 }
0x1207   :  { %v1462_v62 = vmul.f32 %v2598_v60, %v1460_v61  ;;  %v842_v61 = vld [vmem:[#allocation4 + $0x10] sm:$0xff] }
0x1209   :  { %1464 = vrot.lane.b32.xlu0 %v1462_v62, %s2683_s11  ;;  %v1264_v62 = vld [vmem:[#allocation4 + $0x20] sm:$0xff] }
0x1276   :  { %v1570_v2 = vpop.permute.xlu1 %1569 }
0x1277   :  { %v1572_v3 = vadd.f32 %v1570_v2, %v1562_v63  ;;  %v1686_v63 = vld [vmem:[#allocation4 + $0x30] sm:$0xff] }
0x1279   :  { %2599 = vtanh.f32 %v1572_v3 }
0x127b   :  { %v1465_v6 = vpop.permute.xlu0 %1464 }
0x127c   :  { %v1467_v53 = vadd.f32 %v1465_v6, %v1457_v5 }
0x127e   :  { %2601 = vtanh.f32 %v1467_v53 }
0x1283   :  { %v2600_v7 = vpop.eup %2599 }
0x1284   :  { %1575 = vrot.lane.b32.xlu1 %v2600_v7, %s2683_s11  ;;  %v631_v7 = vld [vmem:[#allocation4 + $0x8] sm:$0xff] }
0x1288   :  { %v2602_v9 = vpop.eup %2601 }
0x1289   :  { %1470 = vrot.lane.b32.xlu0 %v2602_v9, %s2683_s11  ;;  %v1897_v9 = vld [vmem:[#allocation4 + $0x38] sm:$0xff] }
0x12f6   :  { %v1576_v10 = vpop.permute.xlu1 %1575 }
0x12f7   :  { %v1578_v11 = vmul.f32 %v2596_v57, %v1576_v10  ;;  %v1053_v10 = vld [vmem:[#allocation4 + $0x18] sm:$0xff] }
0x12f9   :  { %1580 = vrot.lane.b32.xlu0 %v1578_v11, %s2684_s0  ;;  %v1475_v11 = vld [vmem:[#allocation4 + $0x28] sm:$0xff] }
0x12fb   :  { %v1471_v15 = vpop.permute.xlu0 %1470 }
0x12fc   :  { %v3115_v16 = vmul.f32 %v2598_v60, %v1471_v15  ;;  %v420_v60 = vld [vmem:[#allocation4] sm:$0xff] }
0x12fe   :  { %1584 = vrot.lane.b32.xlu1 %v3115_v16, %s2685_s5 }
0x136b   :  { %v1581_v14 = vpop.permute.xlu0 %1580 }
0x136c   :  { %2317 = vmatmul.mubr.msk.f32.vlgmr.msra.gmra.mrb[12].mxu1 %vm218_vm5, %v1581_v14 }
0x136d   :  { %2478 = vmatpush3.bf16.msra.mxu1 %v2801_v33  ;;  %2335 = vmatprep.mubr.msk.f32.mxu1 %vm2680_vm0, %v2681_v1  ;;  %v215_v1 = vadd.f32 %v2876_v55, %v2782_v13 }
0x136e   :  { %2479 = vmatprep.subr.bf16.mxu1 %v2679_v0 }
0x1370   :  { %v1585_v17 = vpop.permute.xlu1 %1584 }
0x1371   :  { %2481 = vmatpush3.bf16.msra.mxu1 %v2818_v38  ;;  %v1587_v18 = vsel %vm218_vm5, %v1581_v14, %v1585_v17 }
0x1372   :  { %2482 = vmatprep.subr.bf16.mxu1 %v2679_v0  ;;  %2306 = vmatmul.mubr.msk.f32.vlgmr.msra.gmra.mrb[22].mxu0 %vm322_vm6, %v1587_v18 }
0x1375   :  { %2484 = vmatpush3.bf16.msra.mxu1 %v2838_v43 }
0x1376   :  { %2485 = vmatprep.subr.bf16.mxu1 %v2679_v0 }
0x1379   :  { %2487 = vmatpush3.bf16.msra.mxu1 %v2856_v48 }
0x143f   :  { %v1761_v33 = vpop.f32.mrb[12].mxu1 }
0x1440   :  { %v1765_v19 = vadd.f32 %v1761_v33, %v215_v1  ;;  %v2318_v21 = vpop.f32.mrb[13].mxu1 }
0x1442   :  { %2603 = vtanh.f32 %v1765_v19  ;;  %v1957_v0 = vmul.f32 -1.442695, %v1765_v19 }
0x1445   :  { %v1657_v38 = vpop.f32.mrb[22].mxu0 }
0x1446   :  { %v1658_v22 = vadd.f32 %v1657_v38, %v2898_v59  ;;  %v2307_v54 = vpop.f32.mrb[23].mxu0 }
0x1448   :  { %2605 = vtanh.f32 %v1658_v22  ;;  %v1955_v48 = vmul.f32 -1.442695, %v1658_v22 }
0x1449   :  { %2607 = vpow2.f32 %v1957_v0 }
0x144a   :  { %2609 = vpow2.f32 %v1955_v48 }
0x144c   :  { %v2604_v23 = vpop.eup %2603 }
0x144d   :  { %1775 = vrot.lane.b32.xlu1 %v2604_v23, %s2683_s11 }
0x1452   :  { %v2606_v43 = vpop.eup %2605 }
0x1453   :  { %1670 = vrot.lane.b32.xlu0 %v2606_v43, %s2683_s11  ;;  %v2608_v13 = vpop.eup %2607 }
0x1454   :  { %v1769_v55 = vadd.f32 1.0, %v2608_v13  ;;  %v2610_v24 = vpop.eup %2609 }
0x1455   :  { %v1664_v25 = vadd.f32 1.0, %v2610_v24 }
0x1456   :  { %2611 = vrcp.f32 %v1769_v55 }
0x1457   :  { %2613 = vrcp.f32 %v1664_v25 }
0x1460   :  { %v2612_v26 = vpop.eup %2611 }
0x1461   :  { %v2614_v30 = vpop.eup %2613  ;;  %v1773_v35 = vmul.f32 %v2612_v26, %v1572_v3 }
0x1462   :  { %v1668_v8 = vmul.f32 %v2614_v30, %v1467_v53 }
0x14bf   :  { %v1776_v27 = vpop.permute.xlu1 %1775 }
0x14c0   :  { %v1778_v28 = vmul.f32 %v2612_v26, %v1776_v27 }
0x14c2   :  { %1780 = vrot.lane.b32.xlu1 %v1778_v28, %s2683_s11 }
0x14c5   :  { %v1671_v34 = vpop.permute.xlu0 %1670 }
0x14c6   :  { %v1673_v29 = vmul.f32 %v2614_v30, %v1671_v34 }
0x14c8   :  { %1675 = vrot.lane.b32.xlu0 %v1673_v29, %s2683_s11 }
0x1534   :  { %v1781_v36 = vpop.permute.xlu1 %1780 }
0x1535   :  { %v1783_v51 = vadd.f32 %v1781_v36, %v1773_v35 }
0x1537   :  { %2615 = vtanh.f32 %v1783_v51 }
0x153a   :  { %v1676_v37 = vpop.permute.xlu0 %1675 }
0x153b   :  { %v1678_v39 = vadd.f32 %v1676_v37, %v1668_v8 }
0x153d   :  { %2617 = vtanh.f32 %v1678_v39 }
0x1541   :  { %v2616_v40 = vpop.eup %2615 }
0x1542   :  { %1786 = vrot.lane.b32.xlu1 %v2616_v40, %s2683_s11 }
0x1547   :  { %v2618_v41 = vpop.eup %2617 }
0x1548   :  { %1681 = vrot.lane.b32.xlu0 %v2618_v41, %s2683_s11 }
0x15b4   :  { %v1787_v42 = vpop.permute.xlu1 %1786 }
0x15b5   :  { %v1789_v12 = vmul.f32 %v2612_v26, %v1787_v42 }
0x15b7   :  { %1791 = vrot.lane.b32.xlu0 %v1789_v12, %s2684_s0 }
0x15ba   :  { %v1682_v44 = vpop.permute.xlu0 %1681 }
0x15bb   :  { %v3141_v45 = vmul.f32 %v2614_v30, %v1682_v44 }
0x15bd   :  { %1795 = vrot.lane.b32.xlu1 %v3141_v45, %s2685_s5 }
0x1629   :  { %v1792_v56 = vpop.permute.xlu0 %1791 }
0x162f   :  { %v1796_v47 = vpop.permute.xlu1 %1795 }
0x1630   :  { %v1798_v49 = vsel %vm218_vm5, %v1792_v56, %v1796_v47 }
0x1631   :  { %2336 = vmatmul.mubr.msk.f32.vlgmr.msra.gmra.mrb[14].mxu1 %vm322_vm6, %v1798_v49 }
0x1704   :  { %v1868_v50 = vpop.f32.mrb[14].mxu1 }
0x1705   :  { %v1869_v57 = vadd.f32 %v1868_v50, %v2898_v59  ;;  %v2337_v52 = vpop.f32.mrb[15].mxu1 }
0x1707   :  { %2619 = vtanh.f32 %v1869_v57  ;;  %v1959_v2 = vmul.f32 -1.442695, %v1869_v57 }
0x1709   :  { %2621 = vpow2.f32 %v1959_v2 }
0x1711   :  { %v2620_v58 = vpop.eup %2619 }
0x1712   :  { %1881 = vrot.lane.b32.xlu0 %v2620_v58, %s2683_s11 }
0x1713   :  { %v2622_v59 = vpop.eup %2621 }
0x1714   :  { %v1875_v3 = vadd.f32 1.0, %v2622_v59 }
0x1716   :  { %422 = vrot.lane.b32.xlu0 %v420_v60, %s2684_s0  ;;  %2623 = vrcp.f32 %v1875_v3 }
0x171a   :  { %844 = vrot.lane.b32.xlu0 %v842_v61, %s2684_s0 }
0x171e   :  { %1266 = vrot.lane.b32.xlu0 %v1264_v62, %s2684_s0 }
0x1720   :  { %v2624_v5 = vpop.eup %2623 }
0x1721   :  { %v1879_v15 = vmul.f32 %v2624_v5, %v1678_v39 }
0x1722   :  { %1688 = vrot.lane.b32.xlu0 %v1686_v63, %s2684_s0 }
0x1726   :  { %1899 = vrot.lane.b32.xlu0 %v1897_v9, %s2684_s0 }
0x1784   :  { %v1882_v6 = vpop.permute.xlu0 %1881 }
0x1785   :  { %v1884_v53 = vmul.f32 %v2624_v5, %v1882_v6 }
0x1787   :  { %1886 = vrot.lane.b32.xlu1 %v1884_v53, %s2683_s11 }
0x1788   :  { %v423_v1 = vpop.permute.xlu0 %422 }
0x1789   :  { %v425_v21 = vmul.f32 %v423_v1, %v2916_v32 }
0x178b   :  { %633 = vrot.lane.b32.xlu1 %v631_v7, %s2684_s0 }
0x178c   :  { %v845_v38 = vpop.permute.xlu0 %844 }
0x178d   :  { %v847_v23 = vmul.f32 %v845_v38, %v2999_v4 }
0x178f   :  { %1055 = vrot.lane.b32.xlu1 %v1053_v10, %s2684_s0 }
0x1790   :  { %v1267_v48 = vpop.permute.xlu0 %1266 }
0x1791   :  { %v1269_v24 = vmul.f32 %v1267_v48, %v3081_v31 }
0x1793   :  { %1477 = vrot.lane.b32.xlu1 %v1475_v11, %s2684_s0 }
0x1794   :  { %v1689_v27 = vpop.permute.xlu0 %1688 }
0x1795   :  { %v1691_v30 = vmul.f32 %v1689_v27, %v3141_v45 }
0x1798   :  { %v1900_v32 = vpop.permute.xlu0 %1899 }
0x17f9   :  { %v1887_v14 = vpop.permute.xlu1 %1886 }
0x17fa   :  { %v1889_v17 = vadd.f32 %v1887_v14, %v1879_v15 }
0x17fc   :  { %2625 = vtanh.f32 %v1889_v17 }
0x17fd   :  { %v634_v33 = vpop.permute.xlu1 %633 }
0x17fe   :  { %v636_v19 = vmul.f32 %v634_v33, %v2957_v20 }
0x1800   :  { %v637_v22 = vadd.f32 %v636_v19, %v425_v21 }
0x1801   :  { %v1056_v54 = vpop.permute.xlu1 %1055 }
0x1802   :  { %v848_v43 = vadd.f32 %v847_v23, %v637_v22  ;;  %v1058_v0 = vmul.f32 %v1056_v54, %v3040_v46 }
0x1804   :  { %v1059_v13 = vadd.f32 %v1058_v0, %v848_v43 }
0x1805   :  { %v1478_v55 = vpop.permute.xlu1 %1477 }
0x1806   :  { %v2626_v18 = vpop.eup %2625  ;;  %v1270_v25 = vadd.f32 %v1269_v24, %v1059_v13  ;;  %v1480_v26 = vmul.f32 %v1478_v55, %v3115_v16 }
0x1807   :  { %1892 = vrot.lane.b32.xlu1 %v2626_v18, %s2683_s11 }
0x1808   :  { %v1481_v20 = vadd.f32 %v1480_v26, %v1270_v25 }
0x180a   :  { %v1692_v29 = vadd.f32 %v1691_v30, %v1481_v20 }
0x1879   :  { %v1893_v28 = vpop.permute.xlu1 %1892 }
0x187a   :  { %v1895_v34 = vmul.f32 %v2624_v5, %v1893_v28 }
0x187c   :  { %v1902_v4 = vmul.f32 %v1900_v32, %v1895_v34 }
0x187e   :  { %v1903_v35 = vadd.f32 %v1902_v4, %v1692_v29 }
0x1880   :  { %1905 = vrot.lane.b32.xlu1 %v1903_v35, %s2684_s0 }
0x18f2   :  { %v1906_v46 = vpop.permute.xlu1 %1905 }
0x18f3   :  { %v1908_v36 = vsel %vm218_vm5, %v1906_v46, 0.0 }
0x18f4   :  { %1909 = vadd.xlane.f32.xlu0 %v1908_v36 }
0x1981   :  { %v1910_v31 = vpop.xlane.xlu0 %1909 }
0x1982   :  { %1912 = vst.msk [vmem:[%s3178_s7] sm:$0xff] %vm1911_vm7, %v1910_v31 }
0x1983   :  { %1917 = vsyncpa [#allocation3], 1 }
0x1984   :  { %1918 = vsyncpa [#allocation5], 1 }

</bundles_post_ra>
